<compile_context>
chip_gen: v5e
topology: v5e:2x2
jax: 0.10.0
libtpu: 0.0.40
codegen_flags: <defaults>
</compile_context>

<pallas_src>
import functools

import jax
import jax.numpy as jnp
from jax.experimental import pallas as pl
from jax.experimental.pallas import tpu as pltpu


def _ceil_to(x, m):
    return ((x + m - 1) // m) * m


# ---------------------------------------------------------------------------
# Kernel 1 (runs once per parameter refresh, not per forward batch):
#   bb_eff = tanh(W*M)_flat @ Wb + bb     (the batch-invariant program term)
# ---------------------------------------------------------------------------
def _fold_kernel(w_ref, m_ref, wb_ref, bb_ref, o_ref):
    # bf16 operands on the MXU, f32 accumulation (wb_ref arrives as bf16).
    p = jnp.tanh(w_ref[...] * m_ref[...]).astype(wb_ref.dtype)   # (8, D), row 0 real
    o_ref[...] = jnp.dot(p, wb_ref[...],
                         preferred_element_type=jnp.float32) + bb_ref[...]


def fold_program_bias(w_flat8, m_flat8, wb_pad_bf16, bb_pad):
    """w_flat8/m_flat8: (8, D) f32 with row 0 real; wb_pad_bf16: (D, F_pad) bf16;
    bb_pad: (1, F_pad) f32.  Returns (1, F_pad) f32 effective bias."""
    F_pad = wb_pad_bf16.shape[1]
    out = pl.pallas_call(
        _fold_kernel,
        out_shape=jax.ShapeDtypeStruct((w_flat8.shape[0], F_pad), jnp.float32),
    )(w_flat8, m_flat8, wb_pad_bf16, bb_pad)
    return out[0:1]


# ---------------------------------------------------------------------------
# Kernel 2 (the per-batch fused forward, single un-gridded invocation):
#   feats = x_patch @ Wb_patch + bb_eff        (backbone stub)
#   Y     = ReLU(feats) @ Wh + bh              (nn.ReLU(), nn.Linear(1000, 2))
# ---------------------------------------------------------------------------
def _fused_fwd_kernel(x_ref, wbp_ref, bbe_ref, wh_ref, bh_ref, o_ref):
    feats = jnp.dot(x_ref[...], wbp_ref[...],
                    preferred_element_type=jnp.float32) + bbe_ref[...]
    h = jnp.maximum(feats, 0.0).astype(wh_ref.dtype)              # nn.ReLU()
    o_ref[...] = jnp.dot(h, wh_ref[...],                          # nn.Linear(1000, 2)
                         preferred_element_type=jnp.float32) + bh_ref[...]


def fused_forward(x_pad, wb_patch, bb_eff, wh_pad, bh_pad):
    B_pad, K_pad = x_pad.shape
    F_pad, O_pad = wh_pad.shape
    flops = 2 * B_pad * K_pad * F_pad + 2 * B_pad * F_pad * O_pad
    bytes_accessed = (x_pad.size * 2 + wb_patch.size * 2 + bb_eff.size * 4
                      + wh_pad.size * 2 + bh_pad.size * 4 + B_pad * O_pad * 4)
    return pl.pallas_call(
        _fused_fwd_kernel,
        out_shape=jax.ShapeDtypeStruct((B_pad, O_pad), jnp.float32),
        cost_estimate=pl.CostEstimate(flops=flops, transcendentals=0,
                                      bytes_accessed=bytes_accessed),
        compiler_params=pltpu.CompilerParams(
            # ~2 MiB actual footprint; 32 MiB == v7x default scoped limit,
            # safe on v5e/v6e/v7x.
            vmem_limit_bytes=32 * 1024 * 1024,
        ),
    )(x_pad, wb_patch, bb_eff, wh_pad, bh_pad)


# ---------------------------------------------------------------------------
# Jitted wrapper: build x_pad directly in bf16, call the fused kernel, slice.
# ---------------------------------------------------------------------------
@functools.partial(jax.jit, static_argnames=("K_patch", "K_pad", "num_classes"))
def _forward_jit(image, wb_patch_bf16, bb_eff, wh_bf16, bh_pad,
                 *, K_patch, K_pad, num_classes):
    B = image.shape[0]
    B_pad = max(8, _ceil_to(B, 8))
    x_pad = jnp.zeros((B_pad, K_pad), jnp.bfloat16)
    x_pad = x_pad.at[:B, :K_patch].set(
        image.reshape(B, K_patch).astype(jnp.bfloat16))
    y_pad = fused_forward(x_pad, wb_patch_bf16, bb_eff, wh_bf16, bh_pad)
    return y_pad[:B, :num_classes]


# ---------------------------------------------------------------------------
# Module-level glue (parameter setup, padding, patch-row gather)
# ---------------------------------------------------------------------------
class ReProgrammingNetwork:
    def __init__(self, key, input_size=16, patch_H_size=8, patch_W_size=8,
                 channel_out=3, feat_dim=1000, num_classes=2):
        self.channel_out = channel_out
        self.input_size = input_size
        self.patch_H_size = patch_H_size
        self.patch_W_size = patch_W_size
        self.feat_dim = feat_dim
        self.num_classes = num_classes

        self.H_start = input_size // 2 - patch_H_size // 2
        self.H_end = self.H_start + patch_H_size
        self.W_start = input_size // 2 - patch_W_size // 2
        self.W_end = self.W_start + patch_W_size

        # Mask M: ones everywhere, zero inside the image patch (non-trainable).
        M = jnp.ones((channel_out, input_size, input_size), jnp.float32)
        M = M.at[:, self.H_start:self.H_end, self.W_start:self.W_end].set(0.0)
        self.M = M

        k_w, k_wb, k_bb, k_wh, k_bh = jax.random.split(key, 5)
        # W = Parameter(torch.randn(channel_out, input_size, input_size))
        self.W = jax.random.normal(
            k_w, (channel_out, input_size, input_size), jnp.float32)

        D = channel_out * input_size * input_size
        # Deterministic backbone stub params (stand-in for swin_v2_s).
        self.wb = 0.02 * jax.random.normal(k_wb, (D, feat_dim), jnp.float32)
        self.bb = 0.01 * jax.random.normal(k_bb, (1, feat_dim), jnp.float32)
        # nn.Linear(1000, 2) params.
        bound = 1.0 / (feat_dim ** 0.5)
        self.wh = bound * jax.random.normal(k_wh, (feat_dim, num_classes), jnp.float32)
        self.bh = bound * jax.random.normal(k_bh, (1, num_classes), jnp.float32)

        # Lane-dense / 128-aligned padded sizes.
        self.D = D
        self.K_patch = channel_out * patch_H_size * patch_W_size
        self.K_pad = _ceil_to(self.K_patch, 128)
        self.F_pad = _ceil_to(feat_dim, 128)
        self.O_pad = _ceil_to(num_classes, 128)

        self.refresh_program()

    def refresh_program(self):
        """Recompute everything derived from the program W and the (frozen)
        backbone/head params.  Call again if self.W / self.wb / ... change
        (e.g. after a training step)."""
        C, H, Wd = self.channel_out, self.input_size, self.input_size

        # ---- fold the batch-invariant program term into an effective bias ----
        wb_pad = jnp.zeros((self.D, self.F_pad), jnp.float32)
        wb_pad = wb_pad.at[:, :self.feat_dim].set(self.wb)
        bb_pad = jnp.zeros((1, self.F_pad), jnp.float32)
        bb_pad = bb_pad.at[:, :self.feat_dim].set(self.bb)

        w_flat8 = jnp.zeros((8, self.D), jnp.float32).at[0].set(self.W.reshape(-1))
        m_flat8 = jnp.zeros((8, self.D), jnp.float32).at[0].set(self.M.reshape(-1))
        self.bb_eff = fold_program_bias(
            w_flat8, m_flat8, wb_pad.astype(jnp.bfloat16), bb_pad)  # (1, F_pad) f32

        # ---- gather the Wb rows that the (nonzero) image patch multiplies ----
        c_idx = jnp.arange(C)[:, None, None]
        h_idx = jnp.arange(self.H_start, self.H_end)[None, :, None]
        w_idx = jnp.arange(self.W_start, self.W_end)[None, None, :]
        rows = (c_idx * (H * Wd) + h_idx * Wd + w_idx).reshape(-1)     # (K_patch,)
        wb_patch = jnp.zeros((self.K_pad, self.F_pad), jnp.float32)
        wb_patch = wb_patch.at[:self.K_patch, :self.feat_dim].set(self.wb[rows, :])
        self.wb_patch_bf16 = wb_patch.astype(jnp.bfloat16)

        # ---- head params, zero-padded to 128-aligned shapes ----
        wh_pad = jnp.zeros((self.F_pad, self.O_pad), jnp.float32)
        wh_pad = wh_pad.at[:self.feat_dim, :self.num_classes].set(self.wh)
        self.wh_bf16 = wh_pad.astype(jnp.bfloat16)
        bh_pad = jnp.zeros((1, self.O_pad), jnp.float32)
        self.bh_pad = bh_pad.at[:, :self.num_classes].set(self.bh)

    def forward(self, image):
        """image: (B, channel_out, patch_H, patch_W) f32 -> (B, num_classes) f32."""
        return _forward_jit(image, self.wb_patch_bf16, self.bb_eff,
                            self.wh_bf16, self.bh_pad,
                            K_patch=self.K_patch, K_pad=self.K_pad,
                            num_classes=self.num_classes)


if __name__ == "__main__":
    key = jax.random.PRNGKey(0)
    k_params, k_img = jax.random.split(key)

    # Image patch (B=2, C=3, 8, 8) placed into a 16x16 canvas.
    net = ReProgrammingNetwork(k_params, input_size=16,
                               patch_H_size=8, patch_W_size=8,
                               channel_out=3, feat_dim=1000, num_classes=2)
    image = jax.random.normal(k_img, (2, 3, 8, 8), jnp.float32)

    y = net.forward(image)
    y = jax.block_until_ready(y)
    assert y.shape == (2, 2) and y.dtype == jnp.float32

    # Pure-JAX f32 reference of the same (stubbed) forward pass.
    B = image.shape[0]
    X = jnp.zeros((B, net.channel_out, net.input_size, net.input_size), jnp.float32)
    X = X.at[:, :, net.H_start:net.H_end, net.W_start:net.W_end].set(image)
    P = jnp.tanh(net.W * net.M)
    X_adv = P[None] + X
    feats = X_adv.reshape(B, -1) @ net.wb + net.bb
    y_ref = jnp.maximum(feats, 0.0) @ net.wh + net.bh
    err = float(jnp.max(jnp.abs(y - y_ref)))
    assert err < 5e-2, f"max abs err vs f32 reference: {err}"

    print("KERNEL_OK")
</pallas_src>

<mosaic_0001>
module attributes {stable_mosaic.version = 11 : i64} {
  func.func @_fold_kernel(%arg0: memref<8x768xf32, #tpu.memory_space<vmem>>, %arg1: memref<8x768xf32, #tpu.memory_space<vmem>>, %arg2: memref<768x1024xbf16, #tpu.memory_space<vmem>>, %arg3: memref<1x1024xf32, #tpu.memory_space<vmem>>, %arg4: memref<8x1024xf32, #tpu.memory_space<vmem>>) attributes {dimension_semantics = [], scalar_prefetch = 0 : i64, scratch_operands = 0 : i64, tpu.core_type = #tpu.core_type<tc>} {
    %c0 = arith.constant 0 : index
    %c0_0 = arith.constant 0 : index
    %0 = vector.load %arg0[%c0, %c0_0] : memref<8x768xf32, #tpu.memory_space<vmem>>, vector<8x768xf32>
    %c0_1 = arith.constant 0 : index
    %c0_2 = arith.constant 0 : index
    %1 = vector.load %arg1[%c0_1, %c0_2] : memref<8x768xf32, #tpu.memory_space<vmem>>, vector<8x768xf32>
    %2 = arith.mulf %0, %1 : vector<8x768xf32>
    %3 = math.tanh %2 : vector<8x768xf32>
    %4 = arith.truncf %3 : vector<8x768xf32> to vector<8x768xbf16>
    %c0_3 = arith.constant 0 : index
    %c0_4 = arith.constant 0 : index
    %5 = vector.load %arg2[%c0_3, %c0_4] : memref<768x1024xbf16, #tpu.memory_space<vmem>>, vector<768x1024xbf16>
    %cst = arith.constant dense<0.000000e+00> : vector<8x1024xf32>
    %6 = tpu.matmul %4, %5, %cst {dimension_numbers = #tpu.dot_dimension_numbers<[1], [0], [0], [1], [0, 0, 1, 1], [], []>} : vector<8x768xbf16>, vector<768x1024xbf16>, vector<8x1024xf32> -> vector<8x1024xf32>
    %c0_5 = arith.constant 0 : index
    %c0_6 = arith.constant 0 : index
    %7 = vector.load %arg3[%c0_5, %c0_6] : memref<1x1024xf32, #tpu.memory_space<vmem>>, vector<1x1024xf32>
    %8 = vector.broadcast %7 : vector<1x1024xf32> to vector<8x1024xf32>
    %9 = arith.addf %6, %8 : vector<8x1024xf32>
    %c0_7 = arith.constant 0 : index
    %c0_8 = arith.constant 0 : index
    %10 = vector.load %arg4[%c0_7, %c0_8] : memref<8x1024xf32, #tpu.memory_space<vmem>>, vector<8x1024xf32>
    tpu.vector_store %arg4[%c0_7, %c0_8], %9 {strides = array<i32>} : memref<8x1024xf32, #tpu.memory_space<vmem>>, vector<8x1024xf32>,
    return
  }
}

</mosaic_0001>

<bundles_post_ra>
// kernel: tpu_custom_call.1
= control target key start
LH: loop header
LB: loop body
LE: loop exit
PB: predicated region body
PF: predicated region fallthrough
CT: control target
= control target key end

     0   :  { %9 = vsyncpa [#allocation3], 0  ;;  %s5295_s0 = inlined_call_operand.hbm [shape: f32[8,768], index: 0, kind: input, shape index: {}]   ;;  %s5296_s1 = inlined_call_operand.hbm [shape: f32[8,768], index: 1, kind: input, shape index: {}]   ;;  %s5297_s2 = inlined_call_operand.hbm [shape: bf16[768,1024], index: 2, kind: input, shape index: {}]   ;;  %s5298_s3 = inlined_call_operand.hbm [shape: f32[1,1024], index: 3, kind: input, shape index: {}]   ;;  %s5299_s4 = inlined_call_operand.hbm [shape: f32[8,1024], index: 4, kind: output, shape index: {}]  }
   0x1   :  { %10 = vsyncpa [#allocation6], 0 }
   0x2   :  { %11 = vsyncpa [#allocation9], 0  ;;  %s29_s17 = sshll.u32 %s5296_s1, 4  ;;  %s30_s17 = int_to_ptr.hbm [resolvable:$true] %s29_s17 }
   0x3   :  { %12 = vsyncpa [#allocation4], 0  ;;  %s5146_s18 = smov [#allocation5]   ;;  %s18_s22 = sshll.u32 %s5295_s0, 4  ;;  %s19_s22 = int_to_ptr.hbm [resolvable:$true] %s18_s22 }
   0x4   :  { %s31_s19 = sshll.u32 %s5146_s18, 4  ;;  %s5147_s23 = smov [#allocation2]   ;;  %s32_s19 = int_to_ptr.vmem [resolvable:$true] %s31_s19 }
   0x5   :  { %34 = dma.hbm_to_vmem [thread:$0]  %s30_s17, 768, %s32_s19, [#allocation6]  }
   0x6   :  { %s20_s24 = sshll.u32 %s5147_s23, 4  ;;  %s39_s27 = sshll.u32 %s5297_s2, 4  ;;  %s21_s24 = int_to_ptr.vmem [resolvable:$true] %s20_s24  ;;  %s40_s27 = int_to_ptr.hbm [resolvable:$true] %s39_s27 }
   0x7   :  { %23 = dma.hbm_to_vmem [thread:$0]  %s19_s22, 768, %s21_s24, [#allocation3]  }
   0x8   :  { %s5148_s1 = smov [#allocation7]   ;;  %s53_s5 = sshll.u32 %s5298_s3, 4  ;;  %s54_s5 = int_to_ptr.hbm [resolvable:$true] %s53_s5 }
   0x9   :  { %s41_s28 = sshll.u32 %s5148_s1, 4  ;;  %s5149_s6 = smov 512   ;;  %s42_s28 = int_to_ptr.vmem [resolvable:$true] %s41_s28 }
   0xa   :  { %s5150_s0 = smov 32   ;;  %s5151_s7 = smov [#allocation8]  }
   0xb   :  { %47 = dma.hbm_to_vmem [thread:$0]  %s40_s27, 49152, %s42_s28, [#allocation6], %s5149_s6, %s5149_s6, %s5150_s0  }
   0xc   :  { %s55_s8 = sshll.u32 %s5151_s7, 4  ;;  %s56_s8 = int_to_ptr.vmem [resolvable:$true] %s55_s8 }
   0xd   :  { %58 = dma.hbm_to_vmem [thread:$0]  %s54_s5, 128, %s56_s8, [#allocation9]  }
   0xe   :  { %5138 = dma.done.wait [#allocation3], 768  }
   0xf   :  { %5139 = vsyncadd [#allocation3], 4294966528 }
  0x10   :  { %5140 = dma.done.wait [#allocation6], 49920  }
  0x11   :  { %5141 = vsyncadd [#allocation6], 4294917376 }
  0x12   :  { %5142 = dma.done.wait [#allocation9], 128  }
  0x13   :  { %5143 = vsyncadd [#allocation9], 4294967168  ;;  %v3304_v0 = vld [vmem:[#allocation7 + $0x1c0] sm:$0xf]  ;;  %s5152_s2 = smov [#allocation10]   ;;  %s3066_s11 = sshll.u32 %s5299_s4, 4  ;;  %s3067_s11 = int_to_ptr.hbm [resolvable:$true] %s3066_s11 }
  0x14   :  { %v4674_v1 = vld [vmem:[#allocation7 + $0x1dc] sm:$0xf0]  ;;  %s3064_s3 = sshll.u32 %s5152_s2, 4  ;;  %s3065_s3 = int_to_ptr.vmem [resolvable:$true] %s3064_s3 }
  0x15   :  { %v3560_v2 = vld [vmem:[#allocation7 + $0x3c0] sm:$0xf]  ;;  %v3305_v3 = vor.u32 %v4674_v1, %v3304_v0 }
  0x16   :  { %v4738_v4 = vld [vmem:[#allocation7 + $0x3dc] sm:$0xf0] }
  0x17   :  { %v3816_v5 = vld [vmem:[#allocation7 + $0x5c0] sm:$0xf]  ;;  %v3561_v7 = vor.u32 %v4738_v4, %v3560_v2  ;;  %2427 = vmatpush.bf16.msra.mxu0 %v3305_v3 }
  0x18   :  { %v4802_v6 = vld [vmem:[#allocation7 + $0x5dc] sm:$0xf0] }
  0x19   :  { %v3817_v8 = vor.u32 %v4802_v6, %v3816_v5  ;;  %v4072_v9 = vld [vmem:[#allocation7 + $0x7c0] sm:$0xf]  ;;  %2440 = vmatpush.bf16.msra.mxu1 %v3561_v7 }
  0x1a   :  { %v4866_v10 = vld [vmem:[#allocation7 + $0x7dc] sm:$0xf0] }
  0x1b   :  { %v3272_v11 = vld [vmem:[#allocation7 + $0x180] sm:$0xf]  ;;  %v4073_v12 = vor.u32 %v4866_v10, %v4072_v9  ;;  %2453 = vmatpush.bf16.msra.mxu2 %v3817_v8 }
  0x1c   :  { %v4666_v13 = vld [vmem:[#allocation7 + $0x19c] sm:$0xf0] }
  0x1d   :  { %v3528_v14 = vld [vmem:[#allocation7 + $0x380] sm:$0xf]  ;;  %v3273_v16 = vor.u32 %v4666_v13, %v3272_v11  ;;  %2466 = vmatpush.bf16.msra.mxu3 %v4073_v12 }
  0x1e   :  { %v4730_v15 = vld [vmem:[#allocation7 + $0x39c] sm:$0xf0] }
  0x1f   :  { %v3529_v17 = vor.u32 %v4730_v15, %v3528_v14  ;;  %v3784_v18 = vld [vmem:[#allocation7 + $0x580] sm:$0xf]  ;;  %2428 = vmatpush.bf16.msra.mxu0 %v3273_v16 }
  0x20   :  { %v4794_v19 = vld [vmem:[#allocation7 + $0x59c] sm:$0xf0] }
  0x21   :  { %v4040_v20 = vld [vmem:[#allocation7 + $0x780] sm:$0xf]  ;;  %v3785_v21 = vor.u32 %v4794_v19, %v3784_v18  ;;  %2441 = vmatpush.bf16.msra.mxu1 %v3529_v17 }
  0x22   :  { %v4858_v22 = vld [vmem:[#allocation7 + $0x79c] sm:$0xf0] }
  0x23   :  { %v3240_v23 = vld [vmem:[#allocation7 + $0x140] sm:$0xf]  ;;  %v4041_v25 = vor.u32 %v4858_v22, %v4040_v20  ;;  %2454 = vmatpush.bf16.msra.mxu2 %v3785_v21 }
  0x24   :  { %v4658_v24 = vld [vmem:[#allocation7 + $0x15c] sm:$0xf0] }
  0x25   :  { %v3496_v26 = vld [vmem:[#allocation7 + $0x340] sm:$0xf]  ;;  %v3241_v29 = vor.u32 %v4658_v24, %v3240_v23  ;;  %2467 = vmatpush.bf16.msra.mxu3 %v4041_v25 }
  0x26   :  { %v4722_v27 = vld [vmem:[#allocation7 + $0x35c] sm:$0xf0] }
  0x27   :  { %v3752_v28 = vld [vmem:[#allocation7 + $0x540] sm:$0xf]  ;;  %v3497_v33 = vor.u32 %v4722_v27, %v3496_v26  ;;  %2429 = vmatpush.bf16.msra.mxu0 %v3241_v29 }
  0x28   :  { %v4786_v30 = vld [vmem:[#allocation7 + $0x55c] sm:$0xf0] }
  0x29   :  { %v4008_v31 = vld [vmem:[#allocation7 + $0x740] sm:$0xf]  ;;  %v3753_v34 = vor.u32 %v4786_v30, %v3752_v28  ;;  %2442 = vmatpush.bf16.msra.mxu1 %v3497_v33  ;;  %v4670_v33 = vld [vmem:[#allocation7 + $0x1c4] sm:$0xf] }
  0x2a   :  { %v4850_v32 = vld [vmem:[#allocation7 + $0x75c] sm:$0xf0] }
  0x2b   :  { %v3208_v35 = vld [vmem:[#allocation7 + $0x100] sm:$0xf]  ;;  %v4009_v38 = vor.u32 %v4850_v32, %v4008_v31  ;;  %2455 = vmatpush.bf16.msra.mxu2 %v3753_v34  ;;  %v3306_v34 = vld [vmem:[#allocation7 + $0x1e0] sm:$0xf0] }
  0x2c   :  { %v4650_v36 = vld [vmem:[#allocation7 + $0x11c] sm:$0xf0] }
  0x2d   :  { %v3464_v37 = vld [vmem:[#allocation7 + $0x300] sm:$0xf]  ;;  %v3209_v44 = vor.u32 %v4650_v36, %v3208_v35  ;;  %2468 = vmatpush.bf16.msra.mxu3 %v4009_v38  ;;  %v3562_v38 = vld [vmem:[#allocation7 + $0x3e0] sm:$0xf0] }
  0x2e   :  { %v4714_v39 = vld [vmem:[#allocation7 + $0x31c] sm:$0xf0] }
  0x2f   :  { %v3720_v40 = vld [vmem:[#allocation7 + $0x500] sm:$0xf]  ;;  %v3465_v45 = vor.u32 %v4714_v39, %v3464_v37  ;;  %2430 = vmatpush.bf16.msra.mxu0 %v3209_v44  ;;  %v4734_v37 = vld [vmem:[#allocation7 + $0x3c4] sm:$0xf] }
  0x30   :  { %v4778_v41 = vld [vmem:[#allocation7 + $0x51c] sm:$0xf0] }
  0x31   :  { %v3976_v42 = vld [vmem:[#allocation7 + $0x700] sm:$0xf]  ;;  %v3721_v46 = vor.u32 %v4778_v41, %v3720_v40  ;;  %2443 = vmatpush.bf16.msra.mxu1 %v3465_v45 }
  0x32   :  { %v4842_v43 = vld [vmem:[#allocation7 + $0x71c] sm:$0xf0] }
  0x33   :  { %v3176_v47 = vld [vmem:[#allocation7 + $0xc0] sm:$0xf]  ;;  %v3977_v50 = vor.u32 %v4842_v43, %v3976_v42  ;;  %2456 = vmatpush.bf16.msra.mxu2 %v3721_v46  ;;  %v3309_v42 = vor.u32 %v4670_v33, %v3306_v34  ;;  %v3565_v46 = vor.u32 %v4734_v37, %v3562_v38  ;;  %v3178_v33 = vld [vmem:[#allocation7 + $0xe0] sm:$0xf0] }
  0x34   :  { %v4642_v48 = vld [vmem:[#allocation7 + $0xdc] sm:$0xf0]  ;;  %v4702_v34 = vld [vmem:[#allocation7 + $0x2c4] sm:$0xf] }
  0x35   :  { %v3432_v49 = vld [vmem:[#allocation7 + $0x2c0] sm:$0xf]  ;;  %v3177_v56 = vor.u32 %v4642_v48, %v3176_v47  ;;  %2469 = vmatpush.bf16.msra.mxu3 %v3977_v50  ;;  %v4662_v48 = vld [vmem:[#allocation7 + $0x184] sm:$0xf] }
  0x36   :  { %v4706_v51 = vld [vmem:[#allocation7 + $0x2dc] sm:$0xf0]  ;;  %v4726_v50 = vld [vmem:[#allocation7 + $0x384] sm:$0xf] }
  0x37   :  { %v3688_v52 = vld [vmem:[#allocation7 + $0x4c0] sm:$0xf]  ;;  %v3433_v57 = vor.u32 %v4706_v51, %v3432_v49  ;;  %2431 = vmatpush.bf16.msra.mxu0 %v3177_v56  ;;  %v3274_v49 = vld [vmem:[#allocation7 + $0x1a0] sm:$0xf0] }
  0x38   :  { %v4770_v53 = vld [vmem:[#allocation7 + $0x4dc] sm:$0xf0]  ;;  %v3530_v51 = vld [vmem:[#allocation7 + $0x3a0] sm:$0xf0] }
  0x39   :  { %v3944_v54 = vld [vmem:[#allocation7 + $0x6c0] sm:$0xf]  ;;  %v3689_v58 = vor.u32 %v4770_v53, %v3688_v52  ;;  %2444 = vmatpush.bf16.msra.mxu1 %v3433_v57 }
  0x3a   :  { %v4834_v55 = vld [vmem:[#allocation7 + $0x6dc] sm:$0xf0] }
  0x3b   :  { %v3144_v59 = vld [vmem:[#allocation7 + $0x80] sm:$0xf]  ;;  %v3945_v62 = vor.u32 %v4834_v55, %v3944_v54  ;;  %2457 = vmatpush.bf16.msra.mxu2 %v3689_v58  ;;  %v3277_v55 = vor.u32 %v4662_v48, %v3274_v49 }
  0x3c   :  { %v4634_v60 = vld [vmem:[#allocation7 + $0x9c] sm:$0xf0] }
  0x3d   :  { %v3400_v61 = vld [vmem:[#allocation7 + $0x280] sm:$0xf]  ;;  %v3145_v4 = vor.u32 %v4634_v60, %v3144_v59  ;;  %2470 = vmatpush.bf16.msra.mxu3 %v3945_v62  ;;  %v3533_v59 = vor.u32 %v4726_v50, %v3530_v51  ;;  %v4654_v60 = vld [vmem:[#allocation7 + $0x144] sm:$0xf] }
  0x3e   :  { %v4698_v63 = vld [vmem:[#allocation7 + $0x29c] sm:$0xf0]  ;;  %v4718_v62 = vld [vmem:[#allocation7 + $0x344] sm:$0xf] }
  0x3f   :  { %v3656_v0 = vld [vmem:[#allocation7 + $0x480] sm:$0xf]  ;;  %v3401_v5 = vor.u32 %v4698_v63, %v3400_v61  ;;  %2432 = vmatpush.bf16.msra.mxu0 %v3145_v4  ;;  %v3242_v61 = vld [vmem:[#allocation7 + $0x160] sm:$0xf0] }
  0x40   :  { %v4762_v1 = vld [vmem:[#allocation7 + $0x49c] sm:$0xf0]  ;;  %v3498_v63 = vld [vmem:[#allocation7 + $0x360] sm:$0xf0] }
  0x41   :  { %v3912_v2 = vld [vmem:[#allocation7 + $0x680] sm:$0xf]  ;;  %v3657_v6 = vor.u32 %v4762_v1, %v3656_v0  ;;  %2445 = vmatpush.bf16.msra.mxu1 %v3401_v5  ;;  %v4646_v5 = vld [vmem:[#allocation7 + $0x104] sm:$0xf] }
  0x42   :  { %v4826_v3 = vld [vmem:[#allocation7 + $0x69c] sm:$0xf0]  ;;  %v4694_v50 = vld [vmem:[#allocation7 + $0x284] sm:$0xf] }
  0x43   :  { %v3112_v7 = vld [vmem:[#allocation7 + $0x40] sm:$0xf]  ;;  %v3913_v10 = vor.u32 %v4826_v3, %v3912_v2  ;;  %2458 = vmatpush.bf16.msra.mxu2 %v3657_v6  ;;  %v3210_v6 = vld [vmem:[#allocation7 + $0x120] sm:$0xf0] }
  0x44   :  { %v4626_v8 = vld [vmem:[#allocation7 + $0x5c] sm:$0xf0]  ;;  %v3402_v51 = vld [vmem:[#allocation7 + $0x2a0] sm:$0xf0] }
  0x45   :  { %v3368_v9 = vld [vmem:[#allocation7 + $0x240] sm:$0xf]  ;;  %v3113_v16 = vor.u32 %v4626_v8, %v3112_v7  ;;  %2471 = vmatpush.bf16.msra.mxu3 %v3913_v10  ;;  %v81_v8 = vld [vmem:[#allocation5] sm:$0xff]  ;;  %v3245_v10 = vor.u32 %v4654_v60, %v3242_v61 }
  0x46   :  { %v4690_v11 = vld [vmem:[#allocation7 + $0x25c] sm:$0xf0] }
  0x47   :  { %v3624_v12 = vld [vmem:[#allocation7 + $0x440] sm:$0xf]  ;;  %v3369_v19 = vor.u32 %v4690_v11, %v3368_v9  ;;  %2433 = vmatpush.bf16.msra.mxu0 %v3113_v16 }
  0x48   :  { %v4754_v13 = vld [vmem:[#allocation7 + $0x45c] sm:$0xf0] }
  0x49   :  { %v3880_v14 = vld [vmem:[#allocation7 + $0x640] sm:$0xf]  ;;  %v3625_v20 = vor.u32 %v4754_v13, %v3624_v12  ;;  %2446 = vmatpush.bf16.msra.mxu1 %v3369_v19  ;;  %v77_v12 = vld [vmem:[#allocation2 + $0x10] sm:$0xff]  ;;  %v82_v19 = vld [vmem:[#allocation5 + $0x8] sm:$0xff] }
  0x4a   :  { %v4818_v15 = vld [vmem:[#allocation7 + $0x65c] sm:$0xf0] }
  0x4b   :  { %v3080_v17 = vld [vmem:[#allocation7] sm:$0xf]  ;;  %v3881_v24 = vor.u32 %v4818_v15, %v3880_v14  ;;  %2459 = vmatpush.bf16.msra.mxu2 %v3625_v20  ;;  %v78_v14 = vld [vmem:[#allocation2 + $0x18] sm:$0xff]  ;;  %v3501_v15 = vor.u32 %v4718_v62, %v3498_v63  ;;  %v4710_v20 = vld [vmem:[#allocation7 + $0x304] sm:$0xf] }
  0x4c   :  { %v4618_v18 = vld [vmem:[#allocation7 + $0x1c] sm:$0xf0] }
  0x4d   :  { %v3336_v21 = vld [vmem:[#allocation7 + $0x200] sm:$0xf]  ;;  %v3081_v31 = vor.u32 %v4618_v18, %v3080_v17  ;;  %2472 = vmatpush.bf16.msra.mxu3 %v3881_v24  ;;  %v84_v17 = vld [vmem:[#allocation5 + $0x18] sm:$0xff] }
  0x4e   :  { %v4682_v22 = vld [vmem:[#allocation7 + $0x21c] sm:$0xf0]  ;;  %v76_v18 = vld [vmem:[#allocation2 + $0x8] sm:$0xff] }
  0x4f   :  { %v3592_v23 = vld [vmem:[#allocation7 + $0x400] sm:$0xf]  ;;  %v3337_v35 = vor.u32 %v4682_v22, %v3336_v21  ;;  %2434 = vmatpush.bf16.msra.mxu0 %v3081_v31  ;;  %v3466_v21 = vld [vmem:[#allocation7 + $0x320] sm:$0xf0]  ;;  %v90_v22 = vmul.f32 %v84_v17, %v78_v14 }
  0x50   :  { %v4746_v25 = vld [vmem:[#allocation7 + $0x41c] sm:$0xf0]  ;;  %v4614_v14 = vld [vmem:[#allocation7 + $0x4] sm:$0xf] }
  0x51   :  { %v3848_v26 = vld [vmem:[#allocation7 + $0x600] sm:$0xf]  ;;  %v3593_v36 = vor.u32 %v4746_v25, %v3592_v23  ;;  %2447 = vmatpush.bf16.msra.mxu1 %v3337_v35  ;;  %v88_v23 = vmul.f32 %v82_v19, %v76_v18  ;;  %v3434_v35 = vld [vmem:[#allocation7 + $0x2e0] sm:$0xf0] }
  0x52   :  { %v4810_v27 = vld [vmem:[#allocation7 + $0x61c] sm:$0xf0]  ;;  %v3082_v18 = vld [vmem:[#allocation7 + $0x20] sm:$0xf0] }
  0x53   :  { %v4328_v28 = vld [vmem:[#allocation7 + $0x9c0] sm:$0xf]  ;;  %v3849_v39 = vor.u32 %v4810_v27, %v3848_v26  ;;  %2460 = vmatpush.bf16.msra.mxu2 %v3593_v36  ;;  %v3213_v26 = vor.u32 %v4646_v5, %v3210_v6  ;;  %v3370_v5 = vld [vmem:[#allocation7 + $0x260] sm:$0xf0] }
  0x54   :  { %v4930_v29 = vld [vmem:[#allocation7 + $0x9dc] sm:$0xf0]  ;;  %v4678_v19 = vld [vmem:[#allocation7 + $0x204] sm:$0xf] }
  0x55   :  { %v4584_v30 = vld [vmem:[#allocation7 + $0xbc0] sm:$0xf]  ;;  %v4329_v40 = vor.u32 %v4930_v29, %v4328_v28  ;;  %2473 = vmatpush.bf16.msra.mxu3 %v3849_v39 }
  0x56   :  { %v4994_v32 = vld [vmem:[#allocation7 + $0xbdc] sm:$0xf0] }
  0x57   :  { %v4585_v41 = vor.u32 %v4994_v32, %v4584_v30  ;;  %v4296_v43 = vld [vmem:[#allocation7 + $0x980] sm:$0xf]  ;;  %2479 = vmatpush.bf16.msrb.mxu0 %v4329_v40  ;;  %2505 = vmatpush.bf16.msrb.mxu2 %v3309_v42  ;;  %v3469_v30 = vor.u32 %v4710_v20, %v3466_v21  ;;  %v4638_v32 = vld [vmem:[#allocation7 + $0xc4] sm:$0xf] }
  0x58   :  { %v4922_v44 = vld [vmem:[#allocation7 + $0x99c] sm:$0xf0]  ;;  %v3181_v39 = vor.u32 %v4638_v32, %v3178_v33  ;;  %v3338_v20 = vld [vmem:[#allocation7 + $0x220] sm:$0xf0] }
  0x59   :  { %v4552_v45 = vld [vmem:[#allocation7 + $0xb80] sm:$0xf]  ;;  %v4297_v52 = vor.u32 %v4922_v44, %v4296_v43  ;;  %2492 = vmatpush.bf16.msrb.mxu1 %v4585_v41  ;;  %2518 = vmatpush.bf16.msrb.mxu3 %v3565_v46  ;;  %v3437_v44 = vor.u32 %v4702_v34, %v3434_v35  ;;  %v4630_v46 = vld [vmem:[#allocation7 + $0x84] sm:$0xf]  ;;  %v3341_v33 = vor.u32 %v4678_v19, %v3338_v20 }
  0x5a   :  { %v4986_v47 = vld [vmem:[#allocation7 + $0xb9c] sm:$0xf0]  ;;  %v4586_v32 = vld [vmem:[#allocation7 + $0xbe0] sm:$0xf0] }
  0x5b   :  { %v4264_v53 = vld [vmem:[#allocation7 + $0x940] sm:$0xf]  ;;  %v4553_v54 = vor.u32 %v4986_v47, %v4552_v45  ;;  %2480 = vmatpush.bf16.msrb.mxu0 %v4297_v52  ;;  %2506 = vmatpush.bf16.msrb.mxu2 %v3277_v55  ;;  %v3146_v47 = vld [vmem:[#allocation7 + $0xa0] sm:$0xf0] }
  0x5c   :  { %v4914_v56 = vld [vmem:[#allocation7 + $0x95c] sm:$0xf0]  ;;  %v4830_v19 = vld [vmem:[#allocation7 + $0x6c4] sm:$0xf] }
  0x5d   :  { %v4520_v57 = vld [vmem:[#allocation7 + $0xb40] sm:$0xf]  ;;  %v4265_v2 = vor.u32 %v4914_v56, %v4264_v53  ;;  %2493 = vmatpush.bf16.msrb.mxu1 %v4553_v54  ;;  %2519 = vmatpush.bf16.msrb.mxu3 %v3533_v59  ;;  %v3149_v59 = vor.u32 %v4630_v46, %v3146_v47  ;;  %v4554_v46 = vld [vmem:[#allocation7 + $0xba0] sm:$0xf0] }
  0x5e   :  { %v4978_v58 = vld [vmem:[#allocation7 + $0xb5c] sm:$0xf0] }
  0x5f   :  { %v4232_v0 = vld [vmem:[#allocation7 + $0x900] sm:$0xf]  ;;  %v4521_v9 = vor.u32 %v4978_v58, %v4520_v57  ;;  %2481 = vmatpush.bf16.msrb.mxu0 %v4265_v2  ;;  %2507 = vmatpush.bf16.msrb.mxu2 %v3245_v10  ;;  %v3114_v2 = vld [vmem:[#allocation7 + $0x60] sm:$0xf0] }
  0x60   :  { %v4906_v1 = vld [vmem:[#allocation7 + $0x91c] sm:$0xf0] }
  0x61   :  { %v4488_v3 = vld [vmem:[#allocation7 + $0xb00] sm:$0xf]  ;;  %v4233_v24 = vor.u32 %v4906_v1, %v4232_v0  ;;  %2494 = vmatpush.bf16.msrb.mxu1 %v4521_v9  ;;  %2520 = vmatpush.bf16.msrb.mxu3 %v3501_v15  ;;  %v3405_v0 = vor.u32 %v4694_v50, %v3402_v51  ;;  %v4622_v1 = vld [vmem:[#allocation7 + $0x44] sm:$0xf]  ;;  %v80_v15 = vld [vmem:[#allocation2 + $0x28] sm:$0xff] }
  0x62   :  { %v4970_v4 = vld [vmem:[#allocation7 + $0xb1c] sm:$0xf0] }
  0x63   :  { %v75_v7 = vld [vmem:[#allocation2] sm:$0xff]  ;;  %v4489_v25 = vor.u32 %v4970_v4, %v4488_v3  ;;  %2482 = vmatpush.bf16.msrb.mxu0 %v4233_v24  ;;  %2508 = vmatpush.bf16.msrb.mxu2 %v3213_v26  ;;  %v85_v3 = vld [vmem:[#allocation5 + $0x20] sm:$0xff] }
  0x64   :  { %v87_v11 = vmul.f32 %v81_v8, %v75_v7  ;;  %v83_v13 = vld [vmem:[#allocation5 + $0x10] sm:$0xff] }
  0x65   :  { %v89_v16 = vmul.f32 %v83_v13, %v77_v12  ;;  %v4200_v27 = vld [vmem:[#allocation7 + $0x8c0] sm:$0xf]  ;;  %2495 = vmatpush.bf16.msrb.mxu1 %v4489_v25  ;;  %2521 = vmatpush.bf16.msrb.mxu3 %v3469_v30  ;;  %v4686_v4 = vld [vmem:[#allocation7 + $0x244] sm:$0xf]  ;;  %v3117_v13 = vor.u32 %v4622_v1, %v3114_v2  ;;  %v3085_v30 = vor.u32 %v4614_v14, %v3082_v18 }
  0x66   :  { %5005 = vtanh.f32 %v87_v11  ;;  %v4898_v28 = vld [vmem:[#allocation7 + $0x8dc] sm:$0xf0]  ;;  %v3373_v17 = vor.u32 %v4686_v4, %v3370_v5  ;;  %v4862_v24 = vld [vmem:[#allocation7 + $0x7c4] sm:$0xf] }
  0x67   :  { %5007 = vtanh.f32 %v89_v16  ;;  %v4456_v29 = vld [vmem:[#allocation7 + $0xac0] sm:$0xf]  ;;  %v4201_v36 = vor.u32 %v4898_v28, %v4200_v27  ;;  %2509 = vmatpush.bf16.msrb.mxu2 %v3181_v39  ;;  %v86_v16 = vld [vmem:[#allocation5 + $0x28] sm:$0xff]  ;;  %v4074_v26 = vld [vmem:[#allocation7 + $0x7e0] sm:$0xf0] }
  0x68   :  { %5009 = vtanh.f32 %v90_v22  ;;  %v4962_v31 = vld [vmem:[#allocation7 + $0xadc] sm:$0xf0]  ;;  %v92_v21 = vmul.f32 %v86_v16, %v80_v15  ;;  %v4798_v22 = vld [vmem:[#allocation7 + $0x5c4] sm:$0xf]  ;;  %v4077_v35 = vor.u32 %v4862_v24, %v4074_v26 }
  0x69   :  { %5011 = vtanh.f32 %v88_v23  ;;  %v4457_v38 = vor.u32 %v4962_v31, %v4456_v29  ;;  %v4168_v40 = vld [vmem:[#allocation7 + $0x880] sm:$0xf]  ;;  %2483 = vmatpush.bf16.msrb.mxu0 %v4201_v36  ;;  %2522 = vmatpush.bf16.msrb.mxu3 %v3437_v44  ;;  %v3818_v23 = vld [vmem:[#allocation7 + $0x5e0] sm:$0xf0] }
  0x6a   :  { %v4890_v41 = vld [vmem:[#allocation7 + $0x89c] sm:$0xf0]  ;;  %v4926_v27 = vld [vmem:[#allocation7 + $0x9c4] sm:$0xf]  ;;  %v3821_v34 = vor.u32 %v4798_v22, %v3818_v23 }
  0x6b   :  { %v4424_v42 = vld [vmem:[#allocation7 + $0xa80] sm:$0xf]  ;;  %v4169_v54 = vor.u32 %v4890_v41, %v4168_v40  ;;  %2496 = vmatpush.bf16.msrb.mxu1 %v4457_v38  ;;  %2510 = vmatpush.bf16.msrb.mxu2 %v3149_v59  ;;  %v4330_v28 = vld [vmem:[#allocation7 + $0x9e0] sm:$0xf0] }
  0x6c   :  { %v5006_v37 = vpop.eup %5005  ;;  %v4954_v45 = vld [vmem:[#allocation7 + $0xa9c] sm:$0xf0]  ;;  %v4990_v31 = vld [vmem:[#allocation7 + $0xbc4] sm:$0xf]  ;;  %v4333_v36 = vor.u32 %v4926_v27, %v4330_v28 }
  0x6d   :  { %v5008_v43 = vpop.eup %5007  ;;  %v5190_v48 = vpack.c.bf16 %v5006_v37, %v5006_v37  ;;  %v4136_v56 = vld [vmem:[#allocation7 + $0x840] sm:$0xf]  ;;  %v4425_v58 = vor.u32 %v4954_v45, %v4424_v42  ;;  %2484 = vmatpush.bf16.msrb.mxu0 %v4169_v54  ;;  %2523 = vmatpush.bf16.msrb.mxu3 %v3405_v0  ;;  %v4790_v37 = vld [vmem:[#allocation7 + $0x584] sm:$0xf]  ;;  %v4589_v40 = vor.u32 %v4990_v31, %v4586_v32 }
  0x6e   :  { %v5010_v49 = vpop.eup %5009  ;;  %v5192_v52 = vpack.c.bf16 %v5008_v43, %v5008_v43  ;;  %v4882_v57 = vld [vmem:[#allocation7 + $0x85c] sm:$0xf0]  ;;  %v3786_v38 = vld [vmem:[#allocation7 + $0x5a0] sm:$0xf0] }
  0x6f   :  { %v5012_v53 = vpop.eup %5011  ;;  %v5194_v55 = vpack.c.bf16 %v5010_v49, %v5010_v49  ;;  %v4392_v61 = vld [vmem:[#allocation7 + $0xa40] sm:$0xf]  ;;  %2435 = vmatmul.bf16.vlgmr.msra.gmra.mxu0 %v5190_v48  ;;  %v4137_v8 = vor.u32 %v4882_v57, %v4136_v56  ;;  %2497 = vmatpush.bf16.msrb.mxu1 %v4425_v58  ;;  %v4854_v39 = vld [vmem:[#allocation7 + $0x784] sm:$0xf]  ;;  %v3789_v49 = vor.u32 %v4790_v37, %v3786_v38 }
  0x70   :  { %v5196_v60 = vpack.c.bf16 %v5012_v53, %v5012_v53  ;;  %v4946_v62 = vld [vmem:[#allocation7 + $0xa5c] sm:$0xf0]  ;;  %2461 = vmatmul.bf16.vlgmr.msra.gmra.mxu2 %v5192_v52  ;;  %v4042_v41 = vld [vmem:[#allocation7 + $0x7a0] sm:$0xf0] }
  0x71   :  { %v79_v63 = vld [vmem:[#allocation2 + $0x20] sm:$0xff]  ;;  %2474 = vmatmul.bf16.vlgmr.msra.gmra.mxu3 %v5194_v55  ;;  %v4393_v12 = vor.u32 %v4946_v62, %v4392_v61  ;;  %2485 = vmatpush.bf16.msrb.mxu0 %v4137_v8  ;;  %v4045_v50 = vor.u32 %v4854_v39, %v4042_v41 }
  0x72   :  { %v4104_v6 = vld [vmem:[#allocation7 + $0x800] sm:$0xf]  ;;  %v91_v7 = vmul.f32 %v85_v3, %v79_v63  ;;  %2448 = vmatmul.bf16.vlgmr.msra.gmra.mxu1 %v5196_v60  ;;  %2511 = vmatpush.bf16.msrb.mxu2 %v3117_v13  ;;  %v4918_v42 = vld [vmem:[#allocation7 + $0x984] sm:$0xf] }
  0x73   :  { %v4874_v9 = vld [vmem:[#allocation7 + $0x81c] sm:$0xf0]  ;;  %2498 = vmatpush.bf16.msrb.mxu1 %v4393_v12  ;;  %2524 = vmatpush.bf16.msrb.mxu3 %v3373_v17  ;;  %v4298_v43 = vld [vmem:[#allocation7 + $0x9a0] sm:$0xf0] }
  0x74   :  { %v4360_v10 = vld [vmem:[#allocation7 + $0xa00] sm:$0xf]  ;;  %5013 = vtanh.f32 %v91_v7  ;;  %v4105_v25 = vor.u32 %v4874_v9, %v4104_v6  ;;  %v4982_v45 = vld [vmem:[#allocation7 + $0xb84] sm:$0xf]  ;;  %v4301_v51 = vor.u32 %v4918_v42, %v4298_v43 }
  0x75   :  { %v4938_v11 = vld [vmem:[#allocation7 + $0xa1c] sm:$0xf0]  ;;  %5015 = vtanh.f32 %v92_v21  ;;  %v4782_v53 = vld [vmem:[#allocation7 + $0x544] sm:$0xf]  ;;  %v4557_v57 = vor.u32 %v4982_v45, %v4554_v46 }
  0x76   :  { %v4361_v29 = vor.u32 %v4938_v11, %v4360_v10  ;;  %2486 = vmatpush.bf16.msrb.mxu0 %v4105_v25  ;;  %2512 = vmatpush.bf16.msrb.mxu2 %v3085_v30  ;;  %v3754_v54 = vld [vmem:[#allocation7 + $0x560] sm:$0xf0] }
  0x77   :  { %2525 = vmatpush.bf16.msrb.mxu3 %v3341_v33  ;;  %v4846_v56 = vld [vmem:[#allocation7 + $0x744] sm:$0xf]  ;;  %v3757_v2 = vor.u32 %v4782_v53, %v3754_v54 }
  0x78   :  { %2499 = vmatpush.bf16.msrb.mxu1 %v4361_v29  ;;  %v4010_v59 = vld [vmem:[#allocation7 + $0x760] sm:$0xf0] }
  0x79   :  { %v4910_v61 = vld [vmem:[#allocation7 + $0x944] sm:$0xf]  ;;  %v4013_v3 = vor.u32 %v4846_v56, %v4010_v59 }
  0x7a   :  { %v5014_v44 = vpop.eup %5013  ;;  %2531 = vmatpush.bf16.msra.mxu0 %v3821_v34  ;;  %2557 = vmatpush.bf16.msra.mxu2 %v4333_v36  ;;  %v4266_v62 = vld [vmem:[#allocation7 + $0x960] sm:$0xf0] }
  0x7b   :  { %v5016_v47 = vpop.eup %5015  ;;  %2570 = vmatpush.bf16.msra.mxu3 %v4589_v40  ;;  %v5202_v58 = vpack.c.bf16 %v5014_v44, %v5014_v44  ;;  %v4974_v63 = vld [vmem:[#allocation7 + $0xb44] sm:$0xf]  ;;  %v4269_v4 = vor.u32 %v4910_v61, %v4266_v62 }
  0x7c   :  { %2544 = vmatpush.bf16.msra.mxu1 %v4077_v35  ;;  %v4522_v0 = vld [vmem:[#allocation7 + $0xb60] sm:$0xf0]  ;;  %v5204_v1 = vpack.c.bf16 %v5016_v47, %v5016_v47 }
  0x7d   :  { %v4774_v5 = vld [vmem:[#allocation7 + $0x504] sm:$0xf]  ;;  %v4525_v8 = vor.u32 %v4974_v63, %v4522_v0 }
  0x7e   :  { %2532 = vmatpush.bf16.msra.mxu0 %v3789_v49  ;;  %2558 = vmatpush.bf16.msra.mxu2 %v4301_v51  ;;  %v3722_v6 = vld [vmem:[#allocation7 + $0x520] sm:$0xf0] }
  0x7f   :  { %v4838_v7 = vld [vmem:[#allocation7 + $0x704] sm:$0xf]  ;;  %2571 = vmatpush.bf16.msra.mxu3 %v4557_v57  ;;  %2487 = vmatmul.bf16.vlgmr.msrb.gmra.mxu0 %v5202_v58  ;;  %v3725_v14 = vor.u32 %v4774_v5, %v3722_v6  ;;  %v4675_v5 = vld [vmem:[#allocation7 + $0x1e4] sm:$0xf0] }
  0x80   :  { %2545 = vmatpush.bf16.msra.mxu1 %v4045_v50  ;;  %v3978_v9 = vld [vmem:[#allocation7 + $0x720] sm:$0xf0]  ;;  %2513 = vmatmul.bf16.vlgmr.msrb.gmra.mxu2 %v5190_v48  ;;  %v3568_v6 = vld [vmem:[#allocation7 + $0x3c8] sm:$0xf] }
  0x81   :  { %v4902_v10 = vld [vmem:[#allocation7 + $0x904] sm:$0xf]  ;;  %2526 = vmatmul.bf16.vlgmr.msrb.gmra.mxu3 %v5196_v60  ;;  %v3981_v15 = vor.u32 %v4838_v7, %v3978_v9  ;;  %v3824_v9 = vld [vmem:[#allocation7 + $0x5c8] sm:$0xf] }
  0x82   :  { %v4234_v11 = vld [vmem:[#allocation7 + $0x920] sm:$0xf0]  ;;  %2500 = vmatmul.bf16.vlgmr.msrb.gmra.mxu1 %v5204_v1  ;;  %2533 = vmatpush.bf16.msra.mxu0 %v3757_v2 }
  0x83   :  { %v4966_v12 = vld [vmem:[#allocation7 + $0xb04] sm:$0xf]  ;;  %2559 = vmatpush.bf16.msra.mxu2 %v4269_v4  ;;  %v4237_v16 = vor.u32 %v4902_v10, %v4234_v11  ;;  %2572 = vmatpush.bf16.msra.mxu3 %v4525_v8  ;;  %v3312_v4 = vld [vmem:[#allocation7 + $0x1c8] sm:$0xf] }
  0x84   :  { %v4490_v13 = vld [vmem:[#allocation7 + $0xb20] sm:$0xf0]  ;;  %2546 = vmatpush.bf16.msra.mxu1 %v4013_v3  ;;  %v4739_v8 = vld [vmem:[#allocation7 + $0x3e4] sm:$0xf0] }
  0x85   :  { %v4766_v17 = vld [vmem:[#allocation7 + $0x4c4] sm:$0xf]  ;;  %v4493_v20 = vor.u32 %v4966_v12, %v4490_v13  ;;  %v4803_v10 = vld [vmem:[#allocation7 + $0x5e4] sm:$0xf0] }
  0x86   :  { %v3690_v18 = vld [vmem:[#allocation7 + $0x4e0] sm:$0xf0]  ;;  %2534 = vmatpush.bf16.msra.mxu0 %v3725_v14  ;;  %v4080_v13 = vld [vmem:[#allocation7 + $0x7c8] sm:$0xf] }
  0x87   :  { %v3946_v21 = vld [vmem:[#allocation7 + $0x6e0] sm:$0xf0]  ;;  %v3693_v26 = vor.u32 %v4766_v17, %v3690_v18  ;;  %2560 = vmatpush.bf16.msra.mxu2 %v4237_v16  ;;  %2573 = vmatpush.bf16.msra.mxu3 %v4493_v20  ;;  %v4867_v14 = vld [vmem:[#allocation7 + $0x7e4] sm:$0xf0]  ;;  %v3313_v16 = vor.u32 %v4675_v5, %v3312_v4  ;;  %v3569_v17 = vor.u32 %v4739_v8, %v3568_v6 }
  0x88   :  { %v4894_v22 = vld [vmem:[#allocation7 + $0x8c4] sm:$0xf]  ;;  %2547 = vmatpush.bf16.msra.mxu1 %v3981_v15  ;;  %v3949_v27 = vor.u32 %v4830_v19, %v3946_v21  ;;  %v3825_v18 = vor.u32 %v4803_v10, %v3824_v9  ;;  %v3280_v19 = vld [vmem:[#allocation7 + $0x188] sm:$0xf] }
  0x89   :  { %v4202_v23 = vld [vmem:[#allocation7 + $0x8e0] sm:$0xf0]  ;;  %v4667_v20 = vld [vmem:[#allocation7 + $0x1a4] sm:$0xf0] }
  0x8a   :  { %v4958_v24 = vld [vmem:[#allocation7 + $0xac4] sm:$0xf]  ;;  %v4205_v28 = vor.u32 %v4894_v22, %v4202_v23  ;;  %2535 = vmatpush.bf16.msra.mxu0 %v3693_v26  ;;  %v3536_v21 = vld [vmem:[#allocation7 + $0x388] sm:$0xf]  ;;  %v4081_v22 = vor.u32 %v4867_v14, %v4080_v13 }
  0x8b   :  { %v4458_v25 = vld [vmem:[#allocation7 + $0xae0] sm:$0xf0]  ;;  %v4731_v23 = vld [vmem:[#allocation7 + $0x3a4] sm:$0xf0] }
  0x8c   :  { %v4758_v29 = vld [vmem:[#allocation7 + $0x484] sm:$0xf]  ;;  %v4461_v32 = vor.u32 %v4958_v24, %v4458_v25  ;;  %2548 = vmatpush.bf16.msra.mxu1 %v3949_v27  ;;  %2561 = vmatpush.bf16.msra.mxu2 %v4205_v28  ;;  %v3792_v24 = vld [vmem:[#allocation7 + $0x588] sm:$0xf]  ;;  %v3281_v28 = vor.u32 %v4667_v20, %v3280_v19 }
  0x8d   :  { %v3658_v30 = vld [vmem:[#allocation7 + $0x4a0] sm:$0xf0]  ;;  %v4795_v25 = vld [vmem:[#allocation7 + $0x5a4] sm:$0xf0] }
  0x8e   :  { %v4822_v31 = vld [vmem:[#allocation7 + $0x684] sm:$0xf]  ;;  %v3661_v38 = vor.u32 %v4758_v29, %v3658_v30  ;;  %2574 = vmatpush.bf16.msra.mxu3 %v4461_v32  ;;  %v4048_v26 = vld [vmem:[#allocation7 + $0x788] sm:$0xf]  ;;  %v3537_v29 = vor.u32 %v4731_v23, %v3536_v21  ;;  %v3793_v30 = vor.u32 %v4795_v25, %v3792_v24 }
  0x8f   :  { %v3914_v33 = vld [vmem:[#allocation7 + $0x6a0] sm:$0xf0]  ;;  %v4859_v27 = vld [vmem:[#allocation7 + $0x7a4] sm:$0xf0] }
  0x90   :  { %v4886_v34 = vld [vmem:[#allocation7 + $0x884] sm:$0xf]  ;;  %v3917_v39 = vor.u32 %v4822_v31, %v3914_v33  ;;  %2536 = vmatpush.bf16.msra.mxu0 %v3661_v38  ;;  %v3248_v31 = vld [vmem:[#allocation7 + $0x148] sm:$0xf] }
  0x91   :  { %v4170_v35 = vld [vmem:[#allocation7 + $0x8a0] sm:$0xf0]  ;;  %v4659_v32 = vld [vmem:[#allocation7 + $0x164] sm:$0xf0] }
  0x92   :  { %v4950_v36 = vld [vmem:[#allocation7 + $0xa84] sm:$0xf]  ;;  %v4173_v40 = vor.u32 %v4886_v34, %v4170_v35  ;;  %2549 = vmatpush.bf16.msra.mxu1 %v3917_v39  ;;  %v3504_v33 = vld [vmem:[#allocation7 + $0x348] sm:$0xf]  ;;  %v4049_v34 = vor.u32 %v4859_v27, %v4048_v26 }
  0x93   :  { %v4426_v37 = vld [vmem:[#allocation7 + $0xaa0] sm:$0xf0]  ;;  %v4723_v35 = vld [vmem:[#allocation7 + $0x364] sm:$0xf0] }
  0x94   :  { %v4750_v41 = vld [vmem:[#allocation7 + $0x444] sm:$0xf]  ;;  %v4429_v44 = vor.u32 %v4950_v36, %v4426_v37  ;;  %2562 = vmatpush.bf16.msra.mxu2 %v4173_v40  ;;  %v3760_v36 = vld [vmem:[#allocation7 + $0x548] sm:$0xf]  ;;  %v3249_v40 = vor.u32 %v4659_v32, %v3248_v31 }
  0x95   :  { %v3626_v42 = vld [vmem:[#allocation7 + $0x460] sm:$0xf0]  ;;  %v4787_v37 = vld [vmem:[#allocation7 + $0x564] sm:$0xf0] }
  0x96   :  { %v4814_v43 = vld [vmem:[#allocation7 + $0x644] sm:$0xf]  ;;  %v3629_v51 = vor.u32 %v4750_v41, %v3626_v42  ;;  %2575 = vmatpush.bf16.msra.mxu3 %v4429_v44  ;;  %v4016_v38 = vld [vmem:[#allocation7 + $0x748] sm:$0xf]  ;;  %v3505_v41 = vor.u32 %v4723_v35, %v3504_v33  ;;  %v3761_v42 = vor.u32 %v4787_v37, %v3760_v36 }
  0x97   :  { %v3882_v45 = vld [vmem:[#allocation7 + $0x660] sm:$0xf0]  ;;  %v4851_v39 = vld [vmem:[#allocation7 + $0x764] sm:$0xf0] }
  0x98   :  { %v4878_v46 = vld [vmem:[#allocation7 + $0x844] sm:$0xf]  ;;  %v3885_v56 = vor.u32 %v4814_v43, %v3882_v45  ;;  %2537 = vmatpush.bf16.msra.mxu0 %v3629_v51  ;;  %v3216_v43 = vld [vmem:[#allocation7 + $0x108] sm:$0xf] }
  0x99   :  { %v4138_v47 = vld [vmem:[#allocation7 + $0x860] sm:$0xf0]  ;;  %v4651_v44 = vld [vmem:[#allocation7 + $0x124] sm:$0xf0] }
  0x9a   :  { %v4942_v49 = vld [vmem:[#allocation7 + $0xa44] sm:$0xf]  ;;  %v4141_v57 = vor.u32 %v4878_v46, %v4138_v47  ;;  %2550 = vmatpush.bf16.msra.mxu1 %v3885_v56  ;;  %v3472_v45 = vld [vmem:[#allocation7 + $0x308] sm:$0xf]  ;;  %v4017_v46 = vor.u32 %v4851_v39, %v4016_v38 }
  0x9b   :  { %v4394_v50 = vld [vmem:[#allocation7 + $0xa60] sm:$0xf0]  ;;  %v4715_v47 = vld [vmem:[#allocation7 + $0x324] sm:$0xf0] }
  0x9c   :  { %v4742_v53 = vld [vmem:[#allocation7 + $0x404] sm:$0xf]  ;;  %v4397_v63 = vor.u32 %v4942_v49, %v4394_v50  ;;  %2563 = vmatpush.bf16.msra.mxu2 %v4141_v57  ;;  %v3728_v49 = vld [vmem:[#allocation7 + $0x508] sm:$0xf]  ;;  %v3473_v56 = vor.u32 %v4715_v47, %v3472_v45  ;;  %v4671_v47 = vld [vmem:[#allocation7 + $0x1cc] sm:$0xf] }
  0x9d   :  { %v3594_v54 = vld [vmem:[#allocation7 + $0x420] sm:$0xf0]  ;;  %v4779_v50 = vld [vmem:[#allocation7 + $0x524] sm:$0xf0] }
  0x9e   :  { %v4806_v59 = vld [vmem:[#allocation7 + $0x604] sm:$0xf]  ;;  %v3597_v7 = vor.u32 %v4742_v53, %v3594_v54  ;;  %2576 = vmatpush.bf16.msra.mxu3 %v4397_v63  ;;  %v3984_v51 = vld [vmem:[#allocation7 + $0x708] sm:$0xf]  ;;  %v3217_v54 = vor.u32 %v4651_v44, %v3216_v43  ;;  %v3729_v57 = vor.u32 %v4779_v50, %v3728_v49  ;;  %v3314_v49 = vld [vmem:[#allocation7 + $0x1e8] sm:$0xf0] }
  0x9f   :  { %v3850_v61 = vld [vmem:[#allocation7 + $0x620] sm:$0xf0]  ;;  %v4843_v53 = vld [vmem:[#allocation7 + $0x724] sm:$0xf0] }
  0xa0   :  { %v4870_v62 = vld [vmem:[#allocation7 + $0x804] sm:$0xf]  ;;  %v3853_v11 = vor.u32 %v4806_v59, %v3850_v61  ;;  %2538 = vmatpush.bf16.msra.mxu0 %v3597_v7  ;;  %v3184_v59 = vld [vmem:[#allocation7 + $0xc8] sm:$0xf]  ;;  %v3985_v63 = vor.u32 %v4843_v53, %v3984_v51  ;;  %v4735_v53 = vld [vmem:[#allocation7 + $0x3cc] sm:$0xf] }
  0xa1   :  { %v4106_v0 = vld [vmem:[#allocation7 + $0x820] sm:$0xf0]  ;;  %v4643_v61 = vld [vmem:[#allocation7 + $0xe4] sm:$0xf0] }
  0xa2   :  { %v4934_v2 = vld [vmem:[#allocation7 + $0xa04] sm:$0xf]  ;;  %v4109_v12 = vor.u32 %v4870_v62, %v4106_v0  ;;  %2551 = vmatpush.bf16.msra.mxu1 %v3853_v11  ;;  %v3440_v62 = vld [vmem:[#allocation7 + $0x2c8] sm:$0xf]  ;;  %v3185_v6 = vor.u32 %v4643_v61, %v3184_v59  ;;  %v3317_v61 = vor.u32 %v4671_v47, %v3314_v49 }
  0xa3   :  { %v4362_v3 = vld [vmem:[#allocation7 + $0xa20] sm:$0xf0]  ;;  %2539 = vmatmul.bf16.vlgmr.msra.gmra.mxu0 %v5192_v52  ;;  %v4707_v0 = vld [vmem:[#allocation7 + $0x2e4] sm:$0xf0] }
  0xa4   :  { %v4365_v15 = vor.u32 %v4934_v2, %v4362_v3  ;;  %2564 = vmatpush.bf16.msra.mxu2 %v4109_v12  ;;  %2583 = vmatpush.bf16.msrb.mxu0 %v3313_v16  ;;  %v3696_v2 = vld [vmem:[#allocation7 + $0x4c8] sm:$0xf]  ;;  %v3441_v7 = vor.u32 %v4707_v0, %v3440_v62 }
  0xa5   :  { %2552 = vmatmul.bf16.vlgmr.msra.gmra.mxu1 %v5194_v55  ;;  %v4771_v3 = vld [vmem:[#allocation7 + $0x4e4] sm:$0xf0] }
  0xa6   :  { %2577 = vmatpush.bf16.msra.mxu3 %v4365_v15  ;;  %2596 = vmatpush.bf16.msrb.mxu1 %v3569_v17  ;;  %v3952_v4 = vld [vmem:[#allocation7 + $0x6c8] sm:$0xf]  ;;  %v3697_v8 = vor.u32 %v4771_v3, %v3696_v2 }
  0xa7   :  { %2565 = vmatmul.bf16.vlgmr.msra.gmra.mxu2 %v5202_v58  ;;  %v4835_v5 = vld [vmem:[#allocation7 + $0x6e4] sm:$0xf0] }
  0xa8   :  { %2609 = vmatpush.bf16.msrb.mxu2 %v3825_v18  ;;  %2584 = vmatpush.bf16.msrb.mxu0 %v3281_v28  ;;  %v3152_v9 = vld [vmem:[#allocation7 + $0x88] sm:$0xf]  ;;  %v3953_v12 = vor.u32 %v4835_v5, %v3952_v4  ;;  %v4663_v4 = vld [vmem:[#allocation7 + $0x18c] sm:$0xf] }
  0xa9   :  { %2578 = vmatmul.bf16.vlgmr.msra.gmra.mxu3 %v5204_v1  ;;  %v4635_v10 = vld [vmem:[#allocation7 + $0xa4] sm:$0xf0]  ;;  %v3282_v5 = vld [vmem:[#allocation7 + $0x1a8] sm:$0xf0] }
  0xaa   :  { %2622 = vmatpush.bf16.msrb.mxu3 %v4081_v22  ;;  %2597 = vmatpush.bf16.msrb.mxu1 %v3537_v29  ;;  %v3408_v11 = vld [vmem:[#allocation7 + $0x288] sm:$0xf]  ;;  %v3153_v18 = vor.u32 %v4635_v10, %v3152_v9  ;;  %v3285_v10 = vor.u32 %v4663_v4, %v3282_v5 }
  0xab   :  { %v4699_v13 = vld [vmem:[#allocation7 + $0x2a4] sm:$0xf0] }
  0xac   :  { %2610 = vmatpush.bf16.msrb.mxu2 %v3793_v30  ;;  %2585 = vmatpush.bf16.msrb.mxu0 %v3249_v40  ;;  %v3664_v14 = vld [vmem:[#allocation7 + $0x488] sm:$0xf]  ;;  %v3409_v19 = vor.u32 %v4699_v13, %v3408_v11 }
  0xad   :  { %v4763_v15 = vld [vmem:[#allocation7 + $0x4a4] sm:$0xf0] }
  0xae   :  { %2623 = vmatpush.bf16.msrb.mxu3 %v4049_v34  ;;  %2598 = vmatpush.bf16.msrb.mxu1 %v3505_v41  ;;  %v3920_v16 = vld [vmem:[#allocation7 + $0x688] sm:$0xf]  ;;  %v3665_v20 = vor.u32 %v4763_v15, %v3664_v14 }
  0xaf   :  { %v4827_v17 = vld [vmem:[#allocation7 + $0x6a4] sm:$0xf0] }
  0xb0   :  { %2611 = vmatpush.bf16.msrb.mxu2 %v3761_v42  ;;  %2586 = vmatpush.bf16.msrb.mxu0 %v3217_v54  ;;  %v3120_v21 = vld [vmem:[#allocation7 + $0x48] sm:$0xf]  ;;  %v3921_v24 = vor.u32 %v4827_v17, %v3920_v16  ;;  %v3570_v54 = vld [vmem:[#allocation7 + $0x3e8] sm:$0xf0] }
  0xb1   :  { %v4627_v22 = vld [vmem:[#allocation7 + $0x64] sm:$0xf0]  ;;  %v3573_v2 = vor.u32 %v4735_v53, %v3570_v54  ;;  %v4655_v16 = vld [vmem:[#allocation7 + $0x14c] sm:$0xf] }
  0xb2   :  { %2624 = vmatpush.bf16.msrb.mxu3 %v4017_v46  ;;  %2599 = vmatpush.bf16.msrb.mxu1 %v3473_v56  ;;  %v3376_v23 = vld [vmem:[#allocation7 + $0x248] sm:$0xf]  ;;  %v3121_v30 = vor.u32 %v4627_v22, %v3120_v21  ;;  %v3250_v17 = vld [vmem:[#allocation7 + $0x168] sm:$0xf0] }
  0xb3   :  { %v4691_v25 = vld [vmem:[#allocation7 + $0x264] sm:$0xf0]  ;;  %v3253_v22 = vor.u32 %v4655_v16, %v3250_v17  ;;  %v4631_v54 = vld [vmem:[#allocation7 + $0x8c] sm:$0xf] }
  0xb4   :  { %2612 = vmatpush.bf16.msrb.mxu2 %v3729_v57  ;;  %2587 = vmatpush.bf16.msrb.mxu0 %v3185_v6  ;;  %v3632_v26 = vld [vmem:[#allocation7 + $0x448] sm:$0xf]  ;;  %v3377_v33 = vor.u32 %v4691_v25, %v3376_v23  ;;  %v4727_v6 = vld [vmem:[#allocation7 + $0x38c] sm:$0xf] }
  0xb5   :  { %v4755_v27 = vld [vmem:[#allocation7 + $0x464] sm:$0xf0]  ;;  %v4615_v17 = vld [vmem:[#allocation7 + $0xc] sm:$0xf] }
  0xb6   :  { %2625 = vmatpush.bf16.msrb.mxu3 %v3985_v63  ;;  %2600 = vmatpush.bf16.msrb.mxu1 %v3441_v7  ;;  %v3888_v28 = vld [vmem:[#allocation7 + $0x648] sm:$0xf]  ;;  %v3633_v34 = vor.u32 %v4755_v27, %v3632_v26  ;;  %v3538_v7 = vld [vmem:[#allocation7 + $0x3a8] sm:$0xf0] }
  0xb7   :  { %v4819_v29 = vld [vmem:[#allocation7 + $0x664] sm:$0xf0]  ;;  %v3541_v14 = vor.u32 %v4727_v6, %v3538_v7  ;;  %v4623_v6 = vld [vmem:[#allocation7 + $0x4c] sm:$0xf] }
  0xb8   :  { %2613 = vmatpush.bf16.msrb.mxu2 %v3697_v8  ;;  %2588 = vmatpush.bf16.msrb.mxu0 %v3153_v18  ;;  %v3088_v31 = vld [vmem:[#allocation7 + $0x8] sm:$0xf]  ;;  %v3889_v38 = vor.u32 %v4819_v29, %v3888_v28  ;;  %v4719_v18 = vld [vmem:[#allocation7 + $0x34c] sm:$0xf] }
  0xb9   :  { %v4619_v32 = vld [vmem:[#allocation7 + $0x24] sm:$0xf0]  ;;  %v4647_v28 = vld [vmem:[#allocation7 + $0x10c] sm:$0xf] }
  0xba   :  { %2626 = vmatpush.bf16.msrb.mxu3 %v3953_v12  ;;  %2601 = vmatpush.bf16.msrb.mxu1 %v3409_v19  ;;  %v3344_v35 = vld [vmem:[#allocation7 + $0x208] sm:$0xf]  ;;  %v3089_v45 = vor.u32 %v4619_v32, %v3088_v31  ;;  %v3506_v19 = vld [vmem:[#allocation7 + $0x368] sm:$0xf0] }
  0xbb   :  { %v4683_v36 = vld [vmem:[#allocation7 + $0x224] sm:$0xf0]  ;;  %v3509_v26 = vor.u32 %v4719_v18, %v3506_v19  ;;  %v3218_v29 = vld [vmem:[#allocation7 + $0x128] sm:$0xf0] }
  0xbc   :  { %2614 = vmatpush.bf16.msrb.mxu2 %v3665_v20  ;;  %v3600_v37 = vld [vmem:[#allocation7 + $0x408] sm:$0xf]  ;;  %2589 = vmatpush.bf16.msrb.mxu0 %v3121_v30  ;;  %v3345_v50 = vor.u32 %v4683_v36, %v3344_v35  ;;  %v4711_v30 = vld [vmem:[#allocation7 + $0x30c] sm:$0xf] }
  0xbd   :  { %v4747_v39 = vld [vmem:[#allocation7 + $0x424] sm:$0xf0]  ;;  %v3474_v31 = vld [vmem:[#allocation7 + $0x328] sm:$0xf0] }
  0xbe   :  { %2627 = vmatpush.bf16.msrb.mxu3 %v3921_v24  ;;  %v3856_v40 = vld [vmem:[#allocation7 + $0x608] sm:$0xf]  ;;  %2602 = vmatpush.bf16.msrb.mxu1 %v3377_v33  ;;  %v3601_v51 = vor.u32 %v4747_v39, %v3600_v37  ;;  %v3122_v7 = vld [vmem:[#allocation7 + $0x68] sm:$0xf0] }
  0xbf   :  { %v4811_v41 = vld [vmem:[#allocation7 + $0x624] sm:$0xf0]  ;;  %v3090_v19 = vld [vmem:[#allocation7 + $0x28] sm:$0xf0] }
  0xc0   :  { %v4336_v42 = vld [vmem:[#allocation7 + $0x9c8] sm:$0xf]  ;;  %2615 = vmatpush.bf16.msrb.mxu2 %v3633_v34  ;;  %v3857_v56 = vor.u32 %v4811_v41, %v3856_v40  ;;  %2590 = vmatpush.bf16.msrb.mxu0 %v3089_v45  ;;  %v3221_v34 = vor.u32 %v4647_v28, %v3218_v29  ;;  %v4639_v40 = vld [vmem:[#allocation7 + $0xcc] sm:$0xf] }
  0xc1   :  { %v4931_v43 = vld [vmem:[#allocation7 + $0x9e4] sm:$0xf0]  ;;  %v3186_v41 = vld [vmem:[#allocation7 + $0xe8] sm:$0xf0] }
  0xc2   :  { %v4592_v44 = vld [vmem:[#allocation7 + $0xbc8] sm:$0xf]  ;;  %2628 = vmatpush.bf16.msrb.mxu3 %v3889_v38  ;;  %v4337_v57 = vor.u32 %v4931_v43, %v4336_v42  ;;  %2603 = vmatpush.bf16.msrb.mxu1 %v3345_v50  ;;  %v3477_v38 = vor.u32 %v4711_v30, %v3474_v31  ;;  %v4703_v42 = vld [vmem:[#allocation7 + $0x2cc] sm:$0xf]  ;;  %v3093_v30 = vor.u32 %v4615_v17, %v3090_v19 }
  0xc3   :  { %v4995_v46 = vld [vmem:[#allocation7 + $0xbe4] sm:$0xf0]  ;;  %2591 = vmatmul.bf16.vlgmr.msrb.gmra.mxu0 %v5190_v48  ;;  %v3442_v43 = vld [vmem:[#allocation7 + $0x2e8] sm:$0xf0] }
  0xc4   :  { %v4593_v59 = vor.u32 %v4995_v46, %v4592_v44  ;;  %v4304_v62 = vld [vmem:[#allocation7 + $0x988] sm:$0xf]  ;;  %2616 = vmatpush.bf16.msrb.mxu2 %v3601_v51  ;;  %2635 = vmatpush.bf16.msra.mxu0 %v4337_v57  ;;  %v3189_v46 = vor.u32 %v4639_v40, %v3186_v41  ;;  %v3445_v51 = vor.u32 %v4703_v42, %v3442_v43  ;;  %v4695_v57 = vld [vmem:[#allocation7 + $0x28c] sm:$0xf] }
  0xc5   :  { %v4923_v63 = vld [vmem:[#allocation7 + $0x9a4] sm:$0xf0]  ;;  %2604 = vmatmul.bf16.vlgmr.msrb.gmra.mxu1 %v5196_v60  ;;  %v4338_v28 = vld [vmem:[#allocation7 + $0x9e8] sm:$0xf0] }
  0xc6   :  { %v4560_v0 = vld [vmem:[#allocation7 + $0xb88] sm:$0xf]  ;;  %2629 = vmatpush.bf16.msrb.mxu3 %v3857_v56  ;;  %v4305_v8 = vor.u32 %v4923_v63, %v4304_v62  ;;  %2648 = vmatpush.bf16.msra.mxu1 %v4593_v59  ;;  %v3154_v56 = vld [vmem:[#allocation7 + $0xa8] sm:$0xf0] }
  0xc7   :  { %v4987_v3 = vld [vmem:[#allocation7 + $0xba4] sm:$0xf0]  ;;  %2617 = vmatmul.bf16.vlgmr.msrb.gmra.mxu2 %v5192_v52  ;;  %v3410_v59 = vld [vmem:[#allocation7 + $0x2a8] sm:$0xf0]  ;;  %v3157_v63 = vor.u32 %v4631_v54, %v3154_v56 }
  0xc8   :  { %2661 = vmatpush.bf16.msra.mxu2 %v3317_v61  ;;  %v4561_v9 = vor.u32 %v4987_v3, %v4560_v0  ;;  %v4272_v11 = vld [vmem:[#allocation7 + $0x948] sm:$0xf]  ;;  %2636 = vmatpush.bf16.msra.mxu0 %v4305_v8  ;;  %v3413_v4 = vor.u32 %v4695_v57, %v3410_v59  ;;  %v4687_v8 = vld [vmem:[#allocation7 + $0x24c] sm:$0xf] }
  0xc9   :  { %v4915_v12 = vld [vmem:[#allocation7 + $0x964] sm:$0xf0]  ;;  %2630 = vmatmul.bf16.vlgmr.msrb.gmra.mxu3 %v5194_v55  ;;  %v4991_v31 = vld [vmem:[#allocation7 + $0xbcc] sm:$0xf] }
  0xca   :  { %v4528_v13 = vld [vmem:[#allocation7 + $0xb48] sm:$0xf]  ;;  %2674 = vmatpush.bf16.msra.mxu3 %v3573_v2  ;;  %v4273_v20 = vor.u32 %v4915_v12, %v4272_v11  ;;  %2649 = vmatpush.bf16.msra.mxu1 %v4561_v9  ;;  %v3378_v9 = vld [vmem:[#allocation7 + $0x268] sm:$0xf0] }
  0xcb   :  { %v4979_v15 = vld [vmem:[#allocation7 + $0xb64] sm:$0xf0]  ;;  %v3381_v18 = vor.u32 %v4687_v8, %v3378_v9  ;;  %v4050_v41 = vld [vmem:[#allocation7 + $0x7a8] sm:$0xf0] }
  0xcc   :  { %2662 = vmatpush.bf16.msra.mxu2 %v3285_v10  ;;  %v4529_v21 = vor.u32 %v4979_v15, %v4528_v13  ;;  %v4240_v23 = vld [vmem:[#allocation7 + $0x908] sm:$0xf]  ;;  %2637 = vmatpush.bf16.msra.mxu0 %v4273_v20  ;;  %v4679_v20 = vld [vmem:[#allocation7 + $0x20c] sm:$0xf] }
  0xcd   :  { %v4907_v24 = vld [vmem:[#allocation7 + $0x924] sm:$0xf0]  ;;  %v4919_v42 = vld [vmem:[#allocation7 + $0x98c] sm:$0xf] }
  0xce   :  { %v4496_v25 = vld [vmem:[#allocation7 + $0xb08] sm:$0xf]  ;;  %2675 = vmatpush.bf16.msra.mxu3 %v3541_v14  ;;  %v4241_v32 = vor.u32 %v4907_v24, %v4240_v23  ;;  %2650 = vmatpush.bf16.msra.mxu1 %v4529_v21  ;;  %v3125_v14 = vor.u32 %v4623_v6, %v3122_v7  ;;  %v3346_v21 = vld [vmem:[#allocation7 + $0x228] sm:$0xf0] }
  0xcf   :  { %v4971_v27 = vld [vmem:[#allocation7 + $0xb24] sm:$0xf0]  ;;  %v3826_v23 = vld [vmem:[#allocation7 + $0x5e8] sm:$0xf0] }
  0xd0   :  { %2663 = vmatpush.bf16.msra.mxu2 %v3253_v22  ;;  %v4497_v33 = vor.u32 %v4971_v27, %v4496_v25  ;;  %v4208_v35 = vld [vmem:[#allocation7 + $0x8c8] sm:$0xf]  ;;  %2638 = vmatpush.bf16.msra.mxu0 %v4241_v32  ;;  %v4799_v22 = vld [vmem:[#allocation7 + $0x5cc] sm:$0xf] }
  0xd1   :  { %v4899_v36 = vld [vmem:[#allocation7 + $0x8e4] sm:$0xf0]  ;;  %v4863_v24 = vld [vmem:[#allocation7 + $0x7cc] sm:$0xf] }
  0xd2   :  { %v4464_v37 = vld [vmem:[#allocation7 + $0xac8] sm:$0xf]  ;;  %2676 = vmatpush.bf16.msra.mxu3 %v3509_v26  ;;  %v4209_v44 = vor.u32 %v4899_v36, %v4208_v35  ;;  %2651 = vmatpush.bf16.msra.mxu1 %v4497_v33  ;;  %v4082_v26 = vld [vmem:[#allocation7 + $0x7e8] sm:$0xf0]  ;;  %v3349_v33 = vor.u32 %v4679_v20, %v3346_v21 }
  0xd3   :  { %v4963_v39 = vld [vmem:[#allocation7 + $0xae4] sm:$0xf0]  ;;  %v4927_v27 = vld [vmem:[#allocation7 + $0x9cc] sm:$0xf]  ;;  %v4085_v35 = vor.u32 %v4863_v24, %v4082_v26 }
  0xd4   :  { %2664 = vmatpush.bf16.msra.mxu2 %v3221_v34  ;;  %v4465_v45 = vor.u32 %v4963_v39, %v4464_v37  ;;  %v4176_v47 = vld [vmem:[#allocation7 + $0x888] sm:$0xf]  ;;  %2639 = vmatpush.bf16.msra.mxu0 %v4209_v44  ;;  %v4594_v32 = vld [vmem:[#allocation7 + $0xbe8] sm:$0xf0]  ;;  %v3829_v34 = vor.u32 %v4799_v22, %v3826_v23  ;;  %v4341_v36 = vor.u32 %v4927_v27, %v4338_v28 }
  0xd5   :  { %v4891_v49 = vld [vmem:[#allocation7 + $0x8a4] sm:$0xf0]  ;;  %v4791_v37 = vld [vmem:[#allocation7 + $0x58c] sm:$0xf]  ;;  %v4597_v40 = vor.u32 %v4991_v31, %v4594_v32 }
  0xd6   :  { %v4432_v50 = vld [vmem:[#allocation7 + $0xa88] sm:$0xf]  ;;  %2677 = vmatpush.bf16.msra.mxu3 %v3477_v38  ;;  %v4177_v61 = vor.u32 %v4891_v49, %v4176_v47  ;;  %2652 = vmatpush.bf16.msra.mxu1 %v4465_v45  ;;  %v3794_v38 = vld [vmem:[#allocation7 + $0x5a8] sm:$0xf0] }
  0xd7   :  { %v4955_v53 = vld [vmem:[#allocation7 + $0xaa4] sm:$0xf0]  ;;  %v4855_v39 = vld [vmem:[#allocation7 + $0x78c] sm:$0xf] }
  0xd8   :  { %2665 = vmatpush.bf16.msra.mxu2 %v3189_v46  ;;  %v4433_v62 = vor.u32 %v4955_v53, %v4432_v50  ;;  %v4144_v0 = vld [vmem:[#allocation7 + $0x848] sm:$0xf]  ;;  %2640 = vmatpush.bf16.msra.mxu0 %v4177_v61  ;;  %v4306_v43 = vld [vmem:[#allocation7 + $0x9a8] sm:$0xf0]  ;;  %v3797_v46 = vor.u32 %v4791_v37, %v3794_v38  ;;  %v4053_v47 = vor.u32 %v4855_v39, %v4050_v41 }
  0xd9   :  { %v4883_v2 = vld [vmem:[#allocation7 + $0x864] sm:$0xf0]  ;;  %v4983_v44 = vld [vmem:[#allocation7 + $0xb8c] sm:$0xf]  ;;  %v4309_v49 = vor.u32 %v4919_v42, %v4306_v43 }
  0xda   :  { %v4400_v3 = vld [vmem:[#allocation7 + $0xa48] sm:$0xf]  ;;  %2678 = vmatpush.bf16.msra.mxu3 %v3445_v51  ;;  %v4145_v10 = vor.u32 %v4883_v2, %v4144_v0  ;;  %2653 = vmatpush.bf16.msra.mxu1 %v4433_v62  ;;  %v4562_v45 = vld [vmem:[#allocation7 + $0xba8] sm:$0xf0] }
  0xdb   :  { %v4947_v5 = vld [vmem:[#allocation7 + $0xa64] sm:$0xf0]  ;;  %v4783_v50 = vld [vmem:[#allocation7 + $0x54c] sm:$0xf]  ;;  %v4565_v54 = vor.u32 %v4983_v44, %v4562_v45 }
  0xdc   :  { %v4112_v11 = vld [vmem:[#allocation7 + $0x808] sm:$0xf]  ;;  %2666 = vmatpush.bf16.msra.mxu2 %v3157_v63  ;;  %v4401_v13 = vor.u32 %v4947_v5, %v4400_v3  ;;  %2641 = vmatpush.bf16.msra.mxu0 %v4145_v10  ;;  %v3762_v51 = vld [vmem:[#allocation7 + $0x568] sm:$0xf0] }
  0xdd   :  { %v4875_v12 = vld [vmem:[#allocation7 + $0x824] sm:$0xf0]  ;;  %v4847_v53 = vld [vmem:[#allocation7 + $0x74c] sm:$0xf]  ;;  %v3765_v63 = vor.u32 %v4783_v50, %v3762_v51 }
  0xde   :  { %v4368_v15 = vld [vmem:[#allocation7 + $0xa08] sm:$0xf]  ;;  %2679 = vmatpush.bf16.msra.mxu3 %v3413_v4  ;;  %v4113_v25 = vor.u32 %v4875_v12, %v4112_v11  ;;  %2654 = vmatpush.bf16.msra.mxu1 %v4401_v13  ;;  %v4018_v56 = vld [vmem:[#allocation7 + $0x768] sm:$0xf0] }
  0xdf   :  { %v4939_v16 = vld [vmem:[#allocation7 + $0xa24] sm:$0xf0]  ;;  %v4911_v57 = vld [vmem:[#allocation7 + $0x94c] sm:$0xf]  ;;  %v4021_v0 = vor.u32 %v4847_v53, %v4018_v56 }
  0xe0   :  { %2667 = vmatpush.bf16.msra.mxu2 %v3125_v14  ;;  %v4369_v29 = vor.u32 %v4939_v16, %v4368_v15  ;;  %2642 = vmatpush.bf16.msra.mxu0 %v4113_v25  ;;  %v4274_v59 = vld [vmem:[#allocation7 + $0x968] sm:$0xf0] }
  0xe1   :  { %v4975_v61 = vld [vmem:[#allocation7 + $0xb4c] sm:$0xf]  ;;  %v4277_v2 = vor.u32 %v4911_v57, %v4274_v59 }
  0xe2   :  { %2680 = vmatpush.bf16.msra.mxu3 %v3381_v18  ;;  %2655 = vmatpush.bf16.msra.mxu1 %v4369_v29  ;;  %v4530_v62 = vld [vmem:[#allocation7 + $0xb68] sm:$0xf0] }
  0xe3   :  { %2643 = vmatmul.bf16.vlgmr.msra.gmra.mxu0 %v5202_v58  ;;  %v4775_v3 = vld [vmem:[#allocation7 + $0x50c] sm:$0xf]  ;;  %v4533_v6 = vor.u32 %v4975_v61, %v4530_v62 }
  0xe4   :  { %2668 = vmatpush.bf16.msra.mxu2 %v3093_v30  ;;  %2687 = vmatpush.bf16.msrb.mxu0 %v3829_v34  ;;  %v3730_v4 = vld [vmem:[#allocation7 + $0x528] sm:$0xf0] }
  0xe5   :  { %2656 = vmatmul.bf16.vlgmr.msra.gmra.mxu1 %v5204_v1  ;;  %v4839_v5 = vld [vmem:[#allocation7 + $0x70c] sm:$0xf]  ;;  %v3733_v12 = vor.u32 %v4775_v3, %v3730_v4  ;;  %v3320_v4 = vld [vmem:[#allocation7 + $0x1d0] sm:$0xf] }
  0xe6   :  { %2681 = vmatpush.bf16.msra.mxu3 %v3349_v33  ;;  %2700 = vmatpush.bf16.msrb.mxu1 %v4085_v35  ;;  %v3986_v7 = vld [vmem:[#allocation7 + $0x728] sm:$0xf0] }
  0xe7   :  { %2669 = vmatmul.bf16.vlgmr.msra.gmra.mxu2 %v5190_v48  ;;  %v4903_v8 = vld [vmem:[#allocation7 + $0x90c] sm:$0xf]  ;;  %v3989_v13 = vor.u32 %v4839_v5, %v3986_v7  ;;  %v4676_v5 = vld [vmem:[#allocation7 + $0x1ec] sm:$0xf0] }
  0xe8   :  { %2713 = vmatpush.bf16.msrb.mxu2 %v4341_v36  ;;  %2688 = vmatpush.bf16.msrb.mxu0 %v3797_v46  ;;  %v4242_v9 = vld [vmem:[#allocation7 + $0x928] sm:$0xf0] }
  0xe9   :  { %2682 = vmatmul.bf16.vlgmr.msra.gmra.mxu3 %v5196_v60  ;;  %v4967_v10 = vld [vmem:[#allocation7 + $0xb0c] sm:$0xf]  ;;  %v4245_v14 = vor.u32 %v4903_v8, %v4242_v9  ;;  %v4740_v9 = vld [vmem:[#allocation7 + $0x3ec] sm:$0xf0] }
  0xea   :  { %2726 = vmatpush.bf16.msrb.mxu3 %v4597_v40  ;;  %2701 = vmatpush.bf16.msrb.mxu1 %v4053_v47  ;;  %v4498_v11 = vld [vmem:[#allocation7 + $0xb28] sm:$0xf0] }
  0xeb   :  { %v4767_v15 = vld [vmem:[#allocation7 + $0x4cc] sm:$0xf]  ;;  %v4501_v18 = vor.u32 %v4967_v10, %v4498_v11  ;;  %v3832_v10 = vld [vmem:[#allocation7 + $0x5d0] sm:$0xf] }
  0xec   :  { %2714 = vmatpush.bf16.msrb.mxu2 %v4309_v49  ;;  %2689 = vmatpush.bf16.msrb.mxu0 %v3765_v63  ;;  %v3698_v16 = vld [vmem:[#allocation7 + $0x4e8] sm:$0xf0]  ;;  %v5222_v49 = vld [vmem:[#allocation8] sm:$0xff]  ;;  %v2436_v7 = vpop.f32.mrf.mxu0  ;;  %v4804_v11 = vld [vmem:[#allocation7 + $0x5ec] sm:$0xf0] }
  0xed   :  { %v4831_v17 = vld [vmem:[#allocation7 + $0x6cc] sm:$0xf]  ;;  %v3701_v24 = vor.u32 %v4767_v15, %v3698_v16  ;;  %v491_v3 = vperm.slane %v5222_v49, 0  ;;  %v4868_v15 = vld [vmem:[#allocation7 + $0x7ec] sm:$0xf0] }
  0xee   :  { %2727 = vmatpush.bf16.msrb.mxu3 %v4565_v54  ;;  %2702 = vmatpush.bf16.msrb.mxu1 %v4021_v0  ;;  %v3954_v19 = vld [vmem:[#allocation7 + $0x6e8] sm:$0xf0] }
  0xef   :  { %v4895_v20 = vld [vmem:[#allocation7 + $0x8cc] sm:$0xf]  ;;  %v3957_v25 = vor.u32 %v4831_v17, %v3954_v19  ;;  %v2449_v16 = vpop.f32.mrf.mxu1  ;;  %v2437_v19 = vadd.f32 %v2436_v7, %v491_v3  ;;  %v4844_v3 = vld [vmem:[#allocation7 + $0x72c] sm:$0xf0] }
  0xf0   :  { %2715 = vmatpush.bf16.msrb.mxu2 %v4277_v2  ;;  %v4210_v21 = vld [vmem:[#allocation7 + $0x8e8] sm:$0xf0]  ;;  %2690 = vmatpush.bf16.msrb.mxu0 %v3733_v12 }
  0xf1   :  { %v4959_v22 = vld [vmem:[#allocation7 + $0xacc] sm:$0xf]  ;;  %v4213_v26 = vor.u32 %v4895_v20, %v4210_v21  ;;  %v3833_v21 = vor.u32 %v4804_v11, %v3832_v10  ;;  %v3192_v10 = vld [vmem:[#allocation7 + $0xd0] sm:$0xf] }
  0xf2   :  { %2728 = vmatpush.bf16.msrb.mxu3 %v4533_v6  ;;  %v4466_v23 = vld [vmem:[#allocation7 + $0xae8] sm:$0xf0]  ;;  %2703 = vmatpush.bf16.msrb.mxu1 %v3989_v13  ;;  %v3576_v6 = vld [vmem:[#allocation7 + $0x3d0] sm:$0xf] }
  0xf3   :  { %v4759_v27 = vld [vmem:[#allocation7 + $0x48c] sm:$0xf]  ;;  %v4469_v30 = vor.u32 %v4959_v22, %v4466_v23  ;;  %v3577_v20 = vor.u32 %v4740_v9, %v3576_v6  ;;  %v3288_v22 = vld [vmem:[#allocation7 + $0x190] sm:$0xf] }
  0xf4   :  { %2716 = vmatpush.bf16.msrb.mxu2 %v4245_v14  ;;  %v3666_v28 = vld [vmem:[#allocation7 + $0x4a8] sm:$0xf0]  ;;  %2691 = vmatpush.bf16.msrb.mxu0 %v3701_v24  ;;  %v4088_v14 = vld [vmem:[#allocation7 + $0x7d0] sm:$0xf] }
  0xf5   :  { %v4823_v29 = vld [vmem:[#allocation7 + $0x68c] sm:$0xf]  ;;  %v3669_v36 = vor.u32 %v4759_v27, %v3666_v28  ;;  %v4668_v23 = vld [vmem:[#allocation7 + $0x1ac] sm:$0xf0] }
  0xf6   :  { %2729 = vmatpush.bf16.msrb.mxu3 %v4501_v18  ;;  %v3922_v31 = vld [vmem:[#allocation7 + $0x6a8] sm:$0xf0]  ;;  %2704 = vmatpush.bf16.msrb.mxu1 %v3957_v25  ;;  %v3321_v18 = vor.u32 %v4676_v5, %v3320_v4  ;;  %v3544_v24 = vld [vmem:[#allocation7 + $0x390] sm:$0xf]  ;;  %v4089_v25 = vor.u32 %v4868_v15, %v4088_v14 }
  0xf7   :  { %v4887_v32 = vld [vmem:[#allocation7 + $0x88c] sm:$0xf]  ;;  %v3925_v37 = vor.u32 %v4823_v29, %v3922_v31  ;;  %v3800_v27 = vld [vmem:[#allocation7 + $0x590] sm:$0xf]  ;;  %v2450_v31 = vadd.f32 %v2449_v16, %v2437_v19 }
  0xf8   :  { %v4178_v33 = vld [vmem:[#allocation7 + $0x8a8] sm:$0xf0]  ;;  %2717 = vmatpush.bf16.msrb.mxu2 %v4213_v26  ;;  %2692 = vmatpush.bf16.msrb.mxu0 %v3669_v36  ;;  %v4732_v26 = vld [vmem:[#allocation7 + $0x3ac] sm:$0xf0] }
  0xf9   :  { %v4951_v34 = vld [vmem:[#allocation7 + $0xa8c] sm:$0xf]  ;;  %v4181_v38 = vor.u32 %v4887_v32, %v4178_v33  ;;  %v4796_v28 = vld [vmem:[#allocation7 + $0x5ac] sm:$0xf0]  ;;  %v3289_v32 = vor.u32 %v4668_v23, %v3288_v22  ;;  %v2462_v33 = vpop.f32.mrf.mxu2 }
  0xfa   :  { %v4434_v35 = vld [vmem:[#allocation7 + $0xaa8] sm:$0xf0]  ;;  %2730 = vmatpush.bf16.msrb.mxu3 %v4469_v30  ;;  %2705 = vmatpush.bf16.msrb.mxu1 %v3925_v37  ;;  %v4056_v29 = vld [vmem:[#allocation7 + $0x790] sm:$0xf]  ;;  %v3801_v36 = vor.u32 %v4796_v28, %v3800_v27 }
  0xfb   :  { %v4751_v39 = vld [vmem:[#allocation7 + $0x44c] sm:$0xf]  ;;  %v4437_v42 = vor.u32 %v4951_v34, %v4434_v35  ;;  %v4860_v30 = vld [vmem:[#allocation7 + $0x7ac] sm:$0xf0]  ;;  %v2475_v34 = vpop.f32.mrf.mxu3  ;;  %v3545_v35 = vor.u32 %v4732_v26, %v3544_v24 }
  0xfc   :  { %v3634_v40 = vld [vmem:[#allocation7 + $0x468] sm:$0xf0]  ;;  %2718 = vmatpush.bf16.msrb.mxu2 %v4181_v38  ;;  %v3256_v37 = vld [vmem:[#allocation7 + $0x150] sm:$0xf] }
  0xfd   :  { %v4815_v41 = vld [vmem:[#allocation7 + $0x64c] sm:$0xf]  ;;  %v3637_v50 = vor.u32 %v4751_v39, %v3634_v40  ;;  %v4660_v38 = vld [vmem:[#allocation7 + $0x16c] sm:$0xf0]  ;;  %v2438_v40 = vpop.f32.mrf.mxu0 }
  0xfe   :  { %v3890_v43 = vld [vmem:[#allocation7 + $0x668] sm:$0xf0]  ;;  %2731 = vmatpush.bf16.msrb.mxu3 %v4437_v42  ;;  %v3512_v39 = vld [vmem:[#allocation7 + $0x350] sm:$0xf] }
  0xff   :  { %v4879_v44 = vld [vmem:[#allocation7 + $0x84c] sm:$0xf]  ;;  %v3893_v56 = vor.u32 %v4815_v41, %v3890_v43  ;;  %2693 = vmatpush.bf16.msrb.mxu0 %v3637_v50  ;;  %v4057_v41 = vor.u32 %v4860_v30, %v4056_v29  ;;  %v4724_v42 = vld [vmem:[#allocation7 + $0x36c] sm:$0xf0]  ;;  %v2463_v50 = vadd.f32 %v2462_v33, %v2450_v31 }
 0x100   :  { %v4146_v45 = vld [vmem:[#allocation7 + $0x868] sm:$0xf0]  ;;  %v3768_v43 = vld [vmem:[#allocation7 + $0x550] sm:$0xf] }
 0x101   :  { %v4943_v46 = vld [vmem:[#allocation7 + $0xa4c] sm:$0xf]  ;;  %v4149_v57 = vor.u32 %v4879_v44, %v4146_v45  ;;  %2706 = vmatpush.bf16.msrb.mxu1 %v3893_v56  ;;  %v4788_v44 = vld [vmem:[#allocation7 + $0x56c] sm:$0xf0]  ;;  %v2476_v4 = vadd.f32 %v2475_v34, %v2463_v50  ;;  %v2464_v6 = vpop.f32.mrf.mxu2 }
 0x102   :  { %v4402_v47 = vld [vmem:[#allocation7 + $0xa68] sm:$0xf0]  ;;  %v4024_v45 = vld [vmem:[#allocation7 + $0x750] sm:$0xf] }
 0x103   :  { %v4743_v51 = vld [vmem:[#allocation7 + $0x40c] sm:$0xf]  ;;  %v4405_v63 = vor.u32 %v4943_v46, %v4402_v47  ;;  %2719 = vmatpush.bf16.msrb.mxu2 %v4149_v57  ;;  %v4852_v46 = vld [vmem:[#allocation7 + $0x76c] sm:$0xf0]  ;;  %v2451_v47 = vpop.f32.mrf.mxu1  ;;  %v2477_v7 = vpop.f32.mrf.mxu3 }
 0x104   :  { %v3602_v53 = vld [vmem:[#allocation7 + $0x428] sm:$0xf0]  ;;  %v3224_v56 = vld [vmem:[#allocation7 + $0x110] sm:$0xf] }
 0x105   :  { %v4807_v54 = vld [vmem:[#allocation7 + $0x60c] sm:$0xf]  ;;  %v3605_v8 = vor.u32 %v4743_v51, %v3602_v53  ;;  %2732 = vmatpush.bf16.msrb.mxu3 %v4405_v63  ;;  %v3257_v51 = vor.u32 %v4660_v38, %v3256_v37  ;;  %v3513_v53 = vor.u32 %v4724_v42, %v3512_v39  ;;  %v4652_v57 = vld [vmem:[#allocation7 + $0x12c] sm:$0xf0]  ;;  %v2488_v19 = vpop.f32.mrf.mxu0 }
 0x106   :  { %v3858_v59 = vld [vmem:[#allocation7 + $0x628] sm:$0xf0]  ;;  %v3736_v63 = vld [vmem:[#allocation7 + $0x510] sm:$0xf]  ;;  %v3225_v5 = vor.u32 %v4652_v57, %v3224_v56 }
 0x107   :  { %v4871_v61 = vld [vmem:[#allocation7 + $0x80c] sm:$0xf]  ;;  %v3861_v12 = vor.u32 %v4807_v54, %v3858_v59  ;;  %2694 = vmatpush.bf16.msrb.mxu0 %v3605_v8  ;;  %v3769_v54 = vor.u32 %v4788_v44, %v3768_v43  ;;  %v3480_v59 = vld [vmem:[#allocation7 + $0x310] sm:$0xf] }
 0x108   :  { %v4114_v62 = vld [vmem:[#allocation7 + $0x828] sm:$0xf0]  ;;  %v4644_v11 = vld [vmem:[#allocation7 + $0xec] sm:$0xf0] }
 0x109   :  { %v4935_v0 = vld [vmem:[#allocation7 + $0xa0c] sm:$0xf]  ;;  %v4117_v13 = vor.u32 %v4871_v61, %v4114_v62  ;;  %2707 = vmatpush.bf16.msrb.mxu1 %v3861_v12  ;;  %v4025_v61 = vor.u32 %v4852_v46, %v4024_v45  ;;  %v4716_v62 = vld [vmem:[#allocation7 + $0x32c] sm:$0xf0]  ;;  %v5229_v45 = vpop.f32.mrf.mxu2 }
 0x10a   :  { %v4370_v2 = vld [vmem:[#allocation7 + $0xa28] sm:$0xf0]  ;;  %2695 = vmatmul.bf16.vlgmr.msrb.gmra.mxu0 %v5192_v52  ;;  %v3481_v8 = vor.u32 %v4716_v62, %v3480_v59  ;;  %v3448_v12 = vld [vmem:[#allocation7 + $0x2d0] sm:$0xf] }
 0x10b   :  { %v4373_v17 = vor.u32 %v4935_v0, %v4370_v2  ;;  %2720 = vmatpush.bf16.msrb.mxu2 %v4117_v13  ;;  %2739 = vmatpush.bf16.msra.mxu0 %v3321_v18  ;;  %v4780_v0 = vld [vmem:[#allocation7 + $0x52c] sm:$0xf0]  ;;  %v2501_v22 = vpop.f32.mrf.mxu1  ;;  %v5231_v50 = vpop.f32.mrf.mxu3 }
 0x10c   :  { %2708 = vmatmul.bf16.vlgmr.msrb.gmra.mxu1 %v5194_v55  ;;  %v3992_v2 = vld [vmem:[#allocation7 + $0x710] sm:$0xf]  ;;  %v3737_v9 = vor.u32 %v4780_v0, %v3736_v63 }
 0x10d   :  { %2733 = vmatpush.bf16.msrb.mxu3 %v4373_v17  ;;  %2752 = vmatpush.bf16.msra.mxu1 %v3577_v20  ;;  %v3993_v13 = vor.u32 %v4844_v3, %v3992_v2  ;;  %v4708_v14 = vld [vmem:[#allocation7 + $0x2ec] sm:$0xf0]  ;;  %v3193_v20 = vor.u32 %v4644_v11, %v3192_v10  ;;  %v4672_v11 = vld [vmem:[#allocation7 + $0x1d4] sm:$0xf] }
 0x10e   :  { %2721 = vmatmul.bf16.vlgmr.msrb.gmra.mxu2 %v5202_v58  ;;  %v3704_v15 = vld [vmem:[#allocation7 + $0x4d0] sm:$0xf]  ;;  %v3449_v23 = vor.u32 %v4708_v14, %v3448_v12  ;;  %v3322_v12 = vld [vmem:[#allocation7 + $0x1f0] sm:$0xf0] }
 0x10f   :  { %2765 = vmatpush.bf16.msra.mxu2 %v3833_v21  ;;  %2740 = vmatpush.bf16.msra.mxu0 %v3289_v32  ;;  %v4772_v16 = vld [vmem:[#allocation7 + $0x4ec] sm:$0xf0]  ;;  %v2489_v21 = vadd.f32 %v2488_v19, %v2476_v4 }
 0x110   :  { %2734 = vmatmul.bf16.vlgmr.msrb.gmra.mxu3 %v5204_v1  ;;  %v3960_v17 = vld [vmem:[#allocation7 + $0x6d0] sm:$0xf]  ;;  %v3705_v24 = vor.u32 %v4772_v16, %v3704_v15  ;;  %v4736_v15 = vld [vmem:[#allocation7 + $0x3d4] sm:$0xf] }
 0x111   :  { %2778 = vmatpush.bf16.msra.mxu3 %v4089_v25  ;;  %2753 = vmatpush.bf16.msra.mxu1 %v3545_v35  ;;  %v4836_v18 = vld [vmem:[#allocation7 + $0x6ec] sm:$0xf0]  ;;  %v2502_v29 = vadd.f32 %v2501_v22, %v2489_v21  ;;  %v3578_v16 = vld [vmem:[#allocation7 + $0x3f0] sm:$0xf0]  ;;  %v3325_v22 = vor.u32 %v4672_v11, %v3322_v12 }
 0x112   :  { %v3160_v25 = vld [vmem:[#allocation7 + $0x90] sm:$0xf]  ;;  %v3961_v28 = vor.u32 %v4836_v18, %v3960_v17 }
 0x113   :  { %2766 = vmatpush.bf16.msra.mxu2 %v3801_v36  ;;  %2741 = vmatpush.bf16.msra.mxu0 %v3257_v51  ;;  %v4636_v26 = vld [vmem:[#allocation7 + $0xac] sm:$0xf0]  ;;  %3051 = vst [vmem:[#allocation10] sm:$0xff] %v2502_v29  ;;  %v2490_v51 = vpop.f32.mrf.mxu0  ;;  %v2503_v57 = vpop.f32.mrf.mxu1  ;;  %v4664_v29 = vld [vmem:[#allocation7 + $0x194] sm:$0xf] }
 0x114   :  { %v3416_v27 = vld [vmem:[#allocation7 + $0x290] sm:$0xf]  ;;  %v3161_v35 = vor.u32 %v4636_v26, %v3160_v25  ;;  %v492_v25 = vperm.slane %v5222_v49, 1  ;;  %v2529_v26 = vpop.f32.mrf.mxu3 }
 0x115   :  { %2779 = vmatpush.bf16.msra.mxu3 %v4057_v41  ;;  %2754 = vmatpush.bf16.msra.mxu1 %v3513_v53  ;;  %v4700_v30 = vld [vmem:[#allocation7 + $0x2ac] sm:$0xf0] }
 0x116   :  { %v3672_v31 = vld [vmem:[#allocation7 + $0x490] sm:$0xf]  ;;  %v3417_v36 = vor.u32 %v4700_v30, %v3416_v27  ;;  %v3581_v27 = vor.u32 %v4736_v15, %v3578_v16  ;;  %v3290_v30 = vld [vmem:[#allocation7 + $0x1b0] sm:$0xf0] }
 0x117   :  { %2767 = vmatpush.bf16.msra.mxu2 %v3769_v54  ;;  %2742 = vmatpush.bf16.msra.mxu0 %v3225_v5  ;;  %v4764_v32 = vld [vmem:[#allocation7 + $0x4ac] sm:$0xf0]  ;;  %v4704_v15 = vld [vmem:[#allocation7 + $0x2d4] sm:$0xf] }
 0x118   :  { %v3928_v33 = vld [vmem:[#allocation7 + $0x690] sm:$0xf]  ;;  %v3673_v37 = vor.u32 %v4764_v32, %v3672_v31  ;;  %v4728_v31 = vld [vmem:[#allocation7 + $0x394] sm:$0xf] }
 0x119   :  { %2780 = vmatpush.bf16.msra.mxu3 %v4025_v61  ;;  %2755 = vmatpush.bf16.msra.mxu1 %v3481_v8  ;;  %v4828_v34 = vld [vmem:[#allocation7 + $0x6ac] sm:$0xf0]  ;;  %v3546_v32 = vld [vmem:[#allocation7 + $0x3b0] sm:$0xf0] }
 0x11a   :  { %v3128_v38 = vld [vmem:[#allocation7 + $0x50] sm:$0xf]  ;;  %v3929_v41 = vor.u32 %v4828_v34, %v3928_v33  ;;  %v3450_v16 = vld [vmem:[#allocation7 + $0x2f0] sm:$0xf0] }
 0x11b   :  { %2768 = vmatpush.bf16.msra.mxu2 %v3737_v9  ;;  %2743 = vmatpush.bf16.msra.mxu0 %v3193_v20  ;;  %v4628_v39 = vld [vmem:[#allocation7 + $0x6c] sm:$0xf0]  ;;  %v2516_v20 = vpop.f32.mrf.mxu2 }
 0x11c   :  { %v3384_v40 = vld [vmem:[#allocation7 + $0x250] sm:$0xf]  ;;  %v3129_v53 = vor.u32 %v4628_v39, %v3128_v38 }
 0x11d   :  { %2781 = vmatpush.bf16.msra.mxu3 %v3993_v13  ;;  %2756 = vmatpush.bf16.msra.mxu1 %v3449_v23  ;;  %v4692_v42 = vld [vmem:[#allocation7 + $0x26c] sm:$0xf0] }
 0x11e   :  { %v3640_v43 = vld [vmem:[#allocation7 + $0x450] sm:$0xf]  ;;  %v3385_v59 = vor.u32 %v4692_v42, %v3384_v40  ;;  %v3549_v40 = vor.u32 %v4728_v31, %v3546_v32  ;;  %v4656_v42 = vld [vmem:[#allocation7 + $0x154] sm:$0xf] }
 0x11f   :  { %2769 = vmatpush.bf16.msra.mxu2 %v3705_v24  ;;  %v4756_v44 = vld [vmem:[#allocation7 + $0x46c] sm:$0xf0]  ;;  %2744 = vmatpush.bf16.msra.mxu0 %v3161_v35  ;;  %v3293_v35 = vor.u32 %v4664_v29, %v3290_v30  ;;  %v4696_v31 = vld [vmem:[#allocation7 + $0x294] sm:$0xf] }
 0x120   :  { %v3896_v46 = vld [vmem:[#allocation7 + $0x650] sm:$0xf]  ;;  %v3641_v61 = vor.u32 %v4756_v44, %v3640_v43  ;;  %v3258_v43 = vld [vmem:[#allocation7 + $0x170] sm:$0xf0] }
 0x121   :  { %2782 = vmatpush.bf16.msra.mxu3 %v3961_v28  ;;  %v4820_v47 = vld [vmem:[#allocation7 + $0x66c] sm:$0xf0]  ;;  %2757 = vmatpush.bf16.msra.mxu1 %v3417_v36  ;;  %v2515_v36 = vadd.f32 %v5229_v45, %v492_v25  ;;  %v4720_v44 = vld [vmem:[#allocation7 + $0x354] sm:$0xf]  ;;  %v3453_v25 = vor.u32 %v4704_v15, %v3450_v16 }
 0x122   :  { %v3096_v54 = vld [vmem:[#allocation7 + $0x10] sm:$0xf]  ;;  %v3897_v2 = vor.u32 %v4820_v47, %v3896_v46  ;;  %v3514_v46 = vld [vmem:[#allocation7 + $0x370] sm:$0xf0] }
 0x123   :  { %v4620_v56 = vld [vmem:[#allocation7 + $0x2c] sm:$0xf0]  ;;  %2770 = vmatpush.bf16.msra.mxu2 %v3673_v37  ;;  %2745 = vmatpush.bf16.msra.mxu0 %v3129_v53  ;;  %v2528_v45 = vadd.f32 %v5231_v50, %v2515_v36  ;;  %v3261_v53 = vor.u32 %v4656_v42, %v3258_v43  ;;  %v3418_v32 = vld [vmem:[#allocation7 + $0x2b0] sm:$0xf0] }
 0x124   :  { %v3352_v62 = vld [vmem:[#allocation7 + $0x210] sm:$0xf]  ;;  %v3097_v9 = vor.u32 %v4620_v56, %v3096_v54  ;;  %v3421_v43 = vor.u32 %v4696_v31, %v3418_v32  ;;  %v4602_v15 = vld [vmem:[#allocation7 + $0xbf0] sm:$0xf0] }
 0x125   :  { %v4684_v63 = vld [vmem:[#allocation7 + $0x22c] sm:$0xf0]  ;;  %2783 = vmatpush.bf16.msra.mxu3 %v3929_v41  ;;  %2758 = vmatpush.bf16.msra.mxu1 %v3385_v59  ;;  %v3517_v59 = vor.u32 %v4720_v44, %v3514_v46  ;;  %v4624_v44 = vld [vmem:[#allocation7 + $0x54] sm:$0xf] }
 0x126   :  { %v3608_v0 = vld [vmem:[#allocation7 + $0x410] sm:$0xf]  ;;  %v3353_v13 = vor.u32 %v4684_v63, %v3352_v62  ;;  %v4648_v62 = vld [vmem:[#allocation7 + $0x114] sm:$0xf] }
 0x127   :  { %v4748_v3 = vld [vmem:[#allocation7 + $0x42c] sm:$0xf0]  ;;  %2771 = vmatpush.bf16.msra.mxu2 %v3641_v61  ;;  %2746 = vmatpush.bf16.msra.mxu0 %v3097_v9  ;;  %v3226_v63 = vld [vmem:[#allocation7 + $0x130] sm:$0xf0] }
 0x128   :  { %v3864_v4 = vld [vmem:[#allocation7 + $0x610] sm:$0xf]  ;;  %v3609_v14 = vor.u32 %v4748_v3, %v3608_v0  ;;  %v4712_v0 = vld [vmem:[#allocation7 + $0x314] sm:$0xf] }
 0x129   :  { %v4812_v5 = vld [vmem:[#allocation7 + $0x62c] sm:$0xf0]  ;;  %2784 = vmatpush.bf16.msra.mxu3 %v3897_v2  ;;  %2759 = vmatpush.bf16.msra.mxu1 %v3353_v13  ;;  %v3482_v2 = vld [vmem:[#allocation7 + $0x330] sm:$0xf0] }
 0x12a   :  { %v4344_v6 = vld [vmem:[#allocation7 + $0x9d0] sm:$0xf]  ;;  %v3865_v17 = vor.u32 %v4812_v5, %v3864_v4  ;;  %2747 = vmatmul.bf16.vlgmr.msra.gmra.mxu0 %v5190_v48  ;;  %v2540_v4 = vpop.f32.mrf.mxu0  ;;  %v3485_v11 = vor.u32 %v4712_v0, %v3482_v2  ;;  %v4640_v13 = vld [vmem:[#allocation7 + $0xd4] sm:$0xf] }
 0x12b   :  { %v4932_v7 = vld [vmem:[#allocation7 + $0x9ec] sm:$0xf0]  ;;  %2772 = vmatpush.bf16.msra.mxu2 %v3609_v14  ;;  %v2541_v9 = vadd.f32 %v2540_v4, %v2528_v45  ;;  %v3194_v14 = vld [vmem:[#allocation7 + $0xf0] sm:$0xf0] }
 0x12c   :  { %v4600_v8 = vld [vmem:[#allocation7 + $0xbd0] sm:$0xf]  ;;  %v4345_v18 = vor.u32 %v4932_v7, %v4344_v6  ;;  %2760 = vmatmul.bf16.vlgmr.msra.gmra.mxu1 %v5196_v60  ;;  %v3229_v6 = vor.u32 %v4648_v62, %v3226_v63  ;;  %v3197_v20 = vor.u32 %v4640_v13, %v3194_v14  ;;  %v2579_v30 = vpop.f32.mrf.mxu3  ;;  %v3130_v46 = vld [vmem:[#allocation7 + $0x70] sm:$0xf0] }
 0x12d   :  { %v4996_v10 = vld [vmem:[#allocation7 + $0xbec] sm:$0xf0]  ;;  %2785 = vmatpush.bf16.msra.mxu3 %v3865_v17  ;;  %v3386_v45 = vld [vmem:[#allocation7 + $0x270] sm:$0xf0] }
 0x12e   :  { %v4312_v19 = vld [vmem:[#allocation7 + $0x990] sm:$0xf]  ;;  %v4601_v21 = vor.u32 %v4996_v10, %v4600_v8  ;;  %2791 = vmatpush.bf16.msrb.mxu0 %v4345_v18  ;;  %2773 = vmatmul.bf16.vlgmr.msra.gmra.mxu2 %v5192_v52  ;;  %v2553_v10 = vpop.f32.mrf.mxu1  ;;  %v4616_v62 = vld [vmem:[#allocation7 + $0x14] sm:$0xf] }
 0x12f   :  { %v4924_v23 = vld [vmem:[#allocation7 + $0x9ac] sm:$0xf0]  ;;  %2817 = vmatpush.bf16.msrb.mxu2 %v3325_v22  ;;  %v2554_v17 = vadd.f32 %v2553_v10, %v2541_v9  ;;  %v3098_v2 = vld [vmem:[#allocation7 + $0x30] sm:$0xf0] }
 0x130   :  { %v4568_v24 = vld [vmem:[#allocation7 + $0xb90] sm:$0xf]  ;;  %v4313_v33 = vor.u32 %v4924_v23, %v4312_v19  ;;  %2804 = vmatpush.bf16.msrb.mxu1 %v4601_v21  ;;  %2786 = vmatmul.bf16.vlgmr.msra.gmra.mxu3 %v5194_v55  ;;  %v3354_v4 = vld [vmem:[#allocation7 + $0x230] sm:$0xf0]  ;;  %v3101_v13 = vor.u32 %v4616_v62, %v3098_v2 }
 0x131   :  { %v4988_v28 = vld [vmem:[#allocation7 + $0xbac] sm:$0xf0]  ;;  %2830 = vmatpush.bf16.msrb.mxu3 %v3581_v27  ;;  %v4632_v27 = vld [vmem:[#allocation7 + $0x94] sm:$0xf] }
 0x132   :  { %v4569_v34 = vor.u32 %v4988_v28, %v4568_v24  ;;  %v4280_v37 = vld [vmem:[#allocation7 + $0x950] sm:$0xf]  ;;  %2792 = vmatpush.bf16.msrb.mxu0 %v4313_v33  ;;  %v2566_v24 = vpop.f32.mrf.mxu2  ;;  %v3162_v28 = vld [vmem:[#allocation7 + $0xb0] sm:$0xf0]  ;;  %v2542_v36 = vpop.f32.mrf.mxu0 }
 0x133   :  { %v4916_v38 = vld [vmem:[#allocation7 + $0x96c] sm:$0xf0]  ;;  %2818 = vmatpush.bf16.msrb.mxu2 %v3293_v35  ;;  %v2567_v29 = vadd.f32 %v2566_v24, %v2554_v17  ;;  %v4090_v9 = vld [vmem:[#allocation7 + $0x7f0] sm:$0xf0] }
 0x134   :  { %v4536_v39 = vld [vmem:[#allocation7 + $0xb50] sm:$0xf]  ;;  %v4281_v47 = vor.u32 %v4916_v38, %v4280_v37  ;;  %2805 = vmatpush.bf16.msrb.mxu1 %v4569_v34  ;;  %v3165_v38 = vor.u32 %v4632_v27, %v3162_v28  ;;  %v4928_v10 = vld [vmem:[#allocation7 + $0x9d4] sm:$0xf] }
 0x135   :  { %v4980_v41 = vld [vmem:[#allocation7 + $0xb6c] sm:$0xf0]  ;;  %2831 = vmatpush.bf16.msrb.mxu3 %v3549_v40  ;;  %v2580_v34 = vadd.f32 %v2579_v30, %v2567_v29  ;;  %v4992_v14 = vld [vmem:[#allocation7 + $0xbd4] sm:$0xf] }
 0x136   :  { %v4537_v51 = vor.u32 %v4980_v41, %v4536_v39  ;;  %v4248_v54 = vld [vmem:[#allocation7 + $0x910] sm:$0xf]  ;;  %2793 = vmatpush.bf16.msrb.mxu0 %v4281_v47  ;;  %v2555_v42 = vpop.f32.mrf.mxu1  ;;  %v4688_v47 = vld [vmem:[#allocation7 + $0x254] sm:$0xf] }
 0x137   :  { %v4908_v56 = vld [vmem:[#allocation7 + $0x92c] sm:$0xf0]  ;;  %2819 = vmatpush.bf16.msrb.mxu2 %v3261_v53  ;;  %3052 = vst [vmem:[#allocation10 + $0x8] sm:$0xff] %v2580_v34  ;;  %v3389_v0 = vor.u32 %v4688_v47, %v3386_v45  ;;  %v4058_v24 = vld [vmem:[#allocation7 + $0x7b0] sm:$0xf0] }
 0x138   :  { %v4504_v57 = vld [vmem:[#allocation7 + $0xb10] sm:$0xf]  ;;  %v4249_v3 = vor.u32 %v4908_v56, %v4248_v54  ;;  %2806 = vmatpush.bf16.msrb.mxu1 %v4537_v51  ;;  %v4984_v27 = vld [vmem:[#allocation7 + $0xb94] sm:$0xf] }
 0x139   :  { %v4972_v61 = vld [vmem:[#allocation7 + $0xb2c] sm:$0xf0]  ;;  %2832 = vmatpush.bf16.msrb.mxu3 %v3517_v59  ;;  %v4570_v28 = vld [vmem:[#allocation7 + $0xbb0] sm:$0xf0] }
 0x13a   :  { %v4505_v5 = vor.u32 %v4972_v61, %v4504_v57  ;;  %v4216_v50 = vld [vmem:[#allocation7 + $0x8d0] sm:$0xf]  ;;  %2794 = vmatpush.bf16.msrb.mxu0 %v4249_v3  ;;  %v3133_v57 = vor.u32 %v4624_v44, %v3130_v46  ;;  %v2568_v63 = vpop.f32.mrf.mxu2  ;;  %v4680_v3 = vld [vmem:[#allocation7 + $0x214] sm:$0xf] }
 0x13b   :  { %v4900_v7 = vld [vmem:[#allocation7 + $0x8ec] sm:$0xf0]  ;;  %2820 = vmatpush.bf16.msrb.mxu2 %v3229_v6  ;;  %v4800_v6 = vld [vmem:[#allocation7 + $0x5d4] sm:$0xf]  ;;  %v3357_v16 = vor.u32 %v4680_v3, %v3354_v4 }
 0x13c   :  { %v4472_v8 = vld [vmem:[#allocation7 + $0xad0] sm:$0xf]  ;;  %v4217_v18 = vor.u32 %v4900_v7, %v4216_v50  ;;  %2807 = vmatpush.bf16.msrb.mxu1 %v4505_v5  ;;  %v2581_v5 = vpop.f32.mrf.mxu3  ;;  %v3834_v50 = vld [vmem:[#allocation7 + $0x5f0] sm:$0xf0] }
 0x13d   :  { %v4964_v12 = vld [vmem:[#allocation7 + $0xaec] sm:$0xf0]  ;;  %2833 = vmatpush.bf16.msrb.mxu3 %v3485_v11  ;;  %v4864_v7 = vld [vmem:[#allocation7 + $0x7d4] sm:$0xf]  ;;  %v3837_v17 = vor.u32 %v4800_v6, %v3834_v50 }
 0x13e   :  { %v4473_v19 = vor.u32 %v4964_v12, %v4472_v8  ;;  %v4184_v21 = vld [vmem:[#allocation7 + $0x890] sm:$0xf]  ;;  %2795 = vmatpush.bf16.msrb.mxu0 %v4217_v18  ;;  %v4346_v11 = vld [vmem:[#allocation7 + $0x9f0] sm:$0xf0]  ;;  %v4093_v18 = vor.u32 %v4864_v7, %v4090_v9 }
 0x13f   :  { %v4892_v22 = vld [vmem:[#allocation7 + $0x8ac] sm:$0xf0]  ;;  %2821 = vmatpush.bf16.msrb.mxu2 %v3197_v20  ;;  %v4792_v20 = vld [vmem:[#allocation7 + $0x594] sm:$0xf] }
 0x140   :  { %v4440_v23 = vld [vmem:[#allocation7 + $0xa90] sm:$0xf]  ;;  %v4185_v33 = vor.u32 %v4892_v22, %v4184_v21  ;;  %2808 = vmatpush.bf16.msrb.mxu1 %v4473_v19  ;;  %v4349_v19 = vor.u32 %v4928_v10, %v4346_v11  ;;  %v3802_v21 = vld [vmem:[#allocation7 + $0x5b0] sm:$0xf0] }
 0x141   :  { %v4956_v26 = vld [vmem:[#allocation7 + $0xaac] sm:$0xf0]  ;;  %2834 = vmatpush.bf16.msrb.mxu3 %v3453_v25  ;;  %v4856_v22 = vld [vmem:[#allocation7 + $0x794] sm:$0xf]  ;;  %v3805_v29 = vor.u32 %v4792_v20, %v3802_v21 }
 0x142   :  { %v4152_v35 = vld [vmem:[#allocation7 + $0x850] sm:$0xf]  ;;  %v4441_v37 = vor.u32 %v4956_v26, %v4440_v23  ;;  %2796 = vmatpush.bf16.msrb.mxu0 %v4185_v33  ;;  %v4605_v23 = vor.u32 %v4992_v14, %v4602_v15  ;;  %v4920_v25 = vld [vmem:[#allocation7 + $0x994] sm:$0xf]  ;;  %v4061_v30 = vor.u32 %v4856_v22, %v4058_v24  ;;  %v5246_v4 = vpop.f32.mrf.mxu1 }
 0x143   :  { %v4884_v39 = vld [vmem:[#allocation7 + $0x86c] sm:$0xf0]  ;;  %2822 = vmatpush.bf16.msrb.mxu2 %v3165_v38  ;;  %v4314_v26 = vld [vmem:[#allocation7 + $0x9b0] sm:$0xf0] }
 0x144   :  { %v4408_v40 = vld [vmem:[#allocation7 + $0xa50] sm:$0xf]  ;;  %v4153_v51 = vor.u32 %v4884_v39, %v4152_v35  ;;  %2809 = vmatpush.bf16.msrb.mxu1 %v4441_v37  ;;  %v4317_v31 = vor.u32 %v4920_v25, %v4314_v26  ;;  %v4784_v32 = vld [vmem:[#allocation7 + $0x554] sm:$0xf]  ;;  %v4573_v35 = vor.u32 %v4984_v27, %v4570_v28 }
 0x145   :  { %v4948_v41 = vld [vmem:[#allocation7 + $0xa6c] sm:$0xf0]  ;;  %2835 = vmatpush.bf16.msrb.mxu3 %v3421_v43  ;;  %v3770_v33 = vld [vmem:[#allocation7 + $0x570] sm:$0xf0] }
 0x146   :  { %v4120_v53 = vld [vmem:[#allocation7 + $0x810] sm:$0xf]  ;;  %v4409_v56 = vor.u32 %v4948_v41, %v4408_v40  ;;  %2797 = vmatpush.bf16.msrb.mxu0 %v4153_v51  ;;  %v4848_v34 = vld [vmem:[#allocation7 + $0x754] sm:$0xf]  ;;  %v3773_v41 = vor.u32 %v4784_v32, %v3770_v33 }
 0x147   :  { %v4876_v54 = vld [vmem:[#allocation7 + $0x82c] sm:$0xf0]  ;;  %2823 = vmatpush.bf16.msrb.mxu2 %v3133_v57  ;;  %v4026_v36 = vld [vmem:[#allocation7 + $0x770] sm:$0xf0] }
 0x148   :  { %v4376_v59 = vld [vmem:[#allocation7 + $0xa10] sm:$0xf]  ;;  %v4121_v8 = vor.u32 %v4876_v54, %v4120_v53  ;;  %2810 = vmatpush.bf16.msrb.mxu1 %v4409_v56  ;;  %v4912_v37 = vld [vmem:[#allocation7 + $0x954] sm:$0xf]  ;;  %v4029_v42 = vor.u32 %v4848_v34, %v4026_v36  ;;  %v493_v36 = vperm.slane %v5222_v49, 2 }
 0x149   :  { %v4940_v61 = vld [vmem:[#allocation7 + $0xa2c] sm:$0xf0]  ;;  %2836 = vmatpush.bf16.msrb.mxu3 %v3389_v0  ;;  %v4282_v38 = vld [vmem:[#allocation7 + $0x970] sm:$0xf0] }
 0x14a   :  { %v4377_v12 = vor.u32 %v4940_v61, %v4376_v59  ;;  %2798 = vmatpush.bf16.msrb.mxu0 %v4121_v8  ;;  %v4976_v39 = vld [vmem:[#allocation7 + $0xb54] sm:$0xf]  ;;  %v4285_v43 = vor.u32 %v4912_v37, %v4282_v38  ;;  %v5244_v59 = vpop.f32.mrf.mxu0  ;;  %v5248_v20 = vpop.f32.mrf.mxu2 }
 0x14b   :  { %2824 = vmatpush.bf16.msrb.mxu2 %v3101_v13  ;;  %v4538_v40 = vld [vmem:[#allocation7 + $0xb70] sm:$0xf0]  ;;  %v2607_v32 = vpop.f32.mrf.mxu1  ;;  %v2593_v49 = vadd.f32 %v5244_v59, %v493_v36 }
 0x14c   :  { %2811 = vmatpush.bf16.msrb.mxu1 %v4377_v12  ;;  %v4776_v44 = vld [vmem:[#allocation7 + $0x514] sm:$0xf]  ;;  %v4541_v45 = vor.u32 %v4976_v39, %v4538_v40  ;;  %v5250_v21 = vpop.f32.mrf.mxu3  ;;  %v3776_v32 = vld [vmem:[#allocation7 + $0x558] sm:$0xf] }
 0x14d   :  { %2837 = vmatpush.bf16.msrb.mxu3 %v3357_v16  ;;  %2799 = vmatmul.bf16.vlgmr.msrb.gmra.mxu0 %v5202_v58  ;;  %v3738_v46 = vld [vmem:[#allocation7 + $0x530] sm:$0xf0]  ;;  %v2606_v59 = vadd.f32 %v5246_v4, %v2593_v49 }
 0x14e   :  { %2843 = vmatpush.bf16.msra.mxu0 %v3837_v17  ;;  %2825 = vmatmul.bf16.vlgmr.msrb.gmra.mxu2 %v5190_v48  ;;  %v4840_v47 = vld [vmem:[#allocation7 + $0x714] sm:$0xf]  ;;  %v3741_v61 = vor.u32 %v4776_v44, %v3738_v46 }
 0x14f   :  { %2869 = vmatpush.bf16.msra.mxu2 %v4349_v19  ;;  %2812 = vmatmul.bf16.vlgmr.msrb.gmra.mxu1 %v5204_v1  ;;  %v3994_v51 = vld [vmem:[#allocation7 + $0x730] sm:$0xf0] }
 0x150   :  { %2856 = vmatpush.bf16.msra.mxu1 %v4093_v18  ;;  %2838 = vmatmul.bf16.vlgmr.msrb.gmra.mxu3 %v5196_v60  ;;  %v4904_v53 = vld [vmem:[#allocation7 + $0x914] sm:$0xf]  ;;  %v3997_v62 = vor.u32 %v4840_v47, %v3994_v51 }
 0x151   :  { %2882 = vmatpush.bf16.msra.mxu3 %v4605_v23  ;;  %v4250_v54 = vld [vmem:[#allocation7 + $0x930] sm:$0xf0] }
 0x152   :  { %2844 = vmatpush.bf16.msra.mxu0 %v3805_v29  ;;  %v4968_v56 = vld [vmem:[#allocation7 + $0xb14] sm:$0xf]  ;;  %v4253_v63 = vor.u32 %v4904_v53, %v4250_v54  ;;  %v2594_v24 = vpop.f32.mrf.mxu0 }
 0x153   :  { %2870 = vmatpush.bf16.msra.mxu2 %v4317_v31  ;;  %v4506_v57 = vld [vmem:[#allocation7 + $0xb30] sm:$0xf0] }
 0x154   :  { %2857 = vmatpush.bf16.msra.mxu1 %v4061_v30  ;;  %v4768_v0 = vld [vmem:[#allocation7 + $0x4d4] sm:$0xf]  ;;  %v4509_v5 = vor.u32 %v4968_v56, %v4506_v57  ;;  %v2620_v56 = vpop.f32.mrf.mxu2  ;;  %v2633_v57 = vpop.f32.mrf.mxu3 }
 0x155   :  { %2883 = vmatpush.bf16.msra.mxu3 %v4573_v35  ;;  %v3706_v2 = vld [vmem:[#allocation7 + $0x4f0] sm:$0xf0]  ;;  %v3200_v57 = vld [vmem:[#allocation7 + $0xd8] sm:$0xf] }
 0x156   :  { %2845 = vmatpush.bf16.msra.mxu0 %v3773_v41  ;;  %v4832_v3 = vld [vmem:[#allocation7 + $0x6d4] sm:$0xf]  ;;  %v3709_v10 = vor.u32 %v4768_v0, %v3706_v2  ;;  %v4741_v2 = vld [vmem:[#allocation7 + $0x3f4] sm:$0xf0] }
 0x157   :  { %2871 = vmatpush.bf16.msra.mxu2 %v4285_v43  ;;  %v3962_v6 = vld [vmem:[#allocation7 + $0x6f0] sm:$0xf0] }
 0x158   :  { %2858 = vmatpush.bf16.msra.mxu1 %v4029_v42  ;;  %v4896_v50 = vld [vmem:[#allocation7 + $0x8d4] sm:$0xf]  ;;  %v3965_v11 = vor.u32 %v4832_v3, %v3962_v6  ;;  %v3840_v3 = vld [vmem:[#allocation7 + $0x5d8] sm:$0xf] }
 0x159   :  { %2884 = vmatpush.bf16.msra.mxu3 %v4541_v45  ;;  %v4218_v7 = vld [vmem:[#allocation7 + $0x8f0] sm:$0xf0] }
 0x15a   :  { %v4960_v8 = vld [vmem:[#allocation7 + $0xad4] sm:$0xf]  ;;  %2846 = vmatpush.bf16.msra.mxu0 %v3741_v61  ;;  %v4221_v12 = vor.u32 %v4896_v50, %v4218_v7  ;;  %v3328_v61 = vld [vmem:[#allocation7 + $0x1d8] sm:$0xf] }
 0x15b   :  { %v4474_v9 = vld [vmem:[#allocation7 + $0xaf0] sm:$0xf0]  ;;  %2872 = vmatpush.bf16.msra.mxu2 %v4253_v63  ;;  %v3584_v63 = vld [vmem:[#allocation7 + $0x3d8] sm:$0xf] }
 0x15c   :  { %2859 = vmatpush.bf16.msra.mxu1 %v3997_v62  ;;  %v4760_v13 = vld [vmem:[#allocation7 + $0x494] sm:$0xf]  ;;  %v4477_v16 = vor.u32 %v4960_v8, %v4474_v9  ;;  %v4677_v62 = vld [vmem:[#allocation7 + $0x1f4] sm:$0xf0] }
 0x15d   :  { %v3674_v14 = vld [vmem:[#allocation7 + $0x4b0] sm:$0xf0]  ;;  %2885 = vmatpush.bf16.msra.mxu3 %v4509_v5  ;;  %v4805_v5 = vld [vmem:[#allocation7 + $0x5f4] sm:$0xf0] }
 0x15e   :  { %v4824_v15 = vld [vmem:[#allocation7 + $0x694] sm:$0xf]  ;;  %2847 = vmatpush.bf16.msra.mxu0 %v3709_v10  ;;  %v3677_v25 = vor.u32 %v4760_v13, %v3674_v14  ;;  %v4096_v7 = vld [vmem:[#allocation7 + $0x7d8] sm:$0xf]  ;;  %v3329_v10 = vor.u32 %v4677_v62, %v3328_v61 }
 0x15f   :  { %v3930_v17 = vld [vmem:[#allocation7 + $0x6b0] sm:$0xf0]  ;;  %2873 = vmatpush.bf16.msra.mxu2 %v4221_v12  ;;  %v4869_v8 = vld [vmem:[#allocation7 + $0x7f4] sm:$0xf0]  ;;  %v3841_v12 = vor.u32 %v4805_v5, %v3840_v3 }
 0x160   :  { %v4888_v18 = vld [vmem:[#allocation7 + $0x894] sm:$0xf]  ;;  %2860 = vmatpush.bf16.msra.mxu1 %v3965_v11  ;;  %v3933_v27 = vor.u32 %v4824_v15, %v3930_v17  ;;  %v3585_v11 = vor.u32 %v4741_v2, %v3584_v63  ;;  %v3296_v13 = vld [vmem:[#allocation7 + $0x198] sm:$0xf] }
 0x161   :  { %v4186_v19 = vld [vmem:[#allocation7 + $0x8b0] sm:$0xf0]  ;;  %2886 = vmatpush.bf16.msra.mxu3 %v4477_v16  ;;  %v4669_v14 = vld [vmem:[#allocation7 + $0x1b4] sm:$0xf0]  ;;  %v4097_v16 = vor.u32 %v4869_v8, %v4096_v7 }
 0x162   :  { %v4952_v22 = vld [vmem:[#allocation7 + $0xa94] sm:$0xf]  ;;  %v4189_v28 = vor.u32 %v4888_v18, %v4186_v19  ;;  %2848 = vmatpush.bf16.msra.mxu0 %v3677_v25  ;;  %v3552_v15 = vld [vmem:[#allocation7 + $0x398] sm:$0xf]  ;;  %v3297_v24 = vor.u32 %v4669_v14, %v3296_v13  ;;  %v2619_v25 = vadd.f32 %v5248_v20, %v2606_v59 }
 0x163   :  { %v4442_v23 = vld [vmem:[#allocation7 + $0xab0] sm:$0xf0]  ;;  %v4733_v17 = vld [vmem:[#allocation7 + $0x3b4] sm:$0xf0] }
 0x164   :  { %v4752_v26 = vld [vmem:[#allocation7 + $0x454] sm:$0xf]  ;;  %v4445_v33 = vor.u32 %v4952_v22, %v4442_v23  ;;  %2861 = vmatpush.bf16.msra.mxu1 %v3933_v27  ;;  %2874 = vmatpush.bf16.msra.mxu2 %v4189_v28  ;;  %v3808_v18 = vld [vmem:[#allocation7 + $0x598] sm:$0xf]  ;;  %v3553_v4 = vor.u32 %v4733_v17, %v3552_v15 }
 0x165   :  { %v3642_v29 = vld [vmem:[#allocation7 + $0x470] sm:$0xf0]  ;;  %v4797_v19 = vld [vmem:[#allocation7 + $0x5b4] sm:$0xf0] }
 0x166   :  { %v4816_v30 = vld [vmem:[#allocation7 + $0x654] sm:$0xf]  ;;  %v3645_v39 = vor.u32 %v4752_v26, %v3642_v29  ;;  %2887 = vmatpush.bf16.msra.mxu3 %v4445_v33  ;;  %v4064_v22 = vld [vmem:[#allocation7 + $0x798] sm:$0xf]  ;;  %v3809_v26 = vor.u32 %v4797_v19, %v3808_v18 }
 0x167   :  { %v3898_v31 = vld [vmem:[#allocation7 + $0x670] sm:$0xf0]  ;;  %v4861_v23 = vld [vmem:[#allocation7 + $0x7b4] sm:$0xf0] }
 0x168   :  { %v4880_v34 = vld [vmem:[#allocation7 + $0x854] sm:$0xf]  ;;  %v3901_v42 = vor.u32 %v4816_v30, %v3898_v31  ;;  %2849 = vmatpush.bf16.msra.mxu0 %v3645_v39  ;;  %v3264_v27 = vld [vmem:[#allocation7 + $0x158] sm:$0xf]  ;;  %v4065_v30 = vor.u32 %v4861_v23, %v4064_v22 }
 0x169   :  { %v4154_v35 = vld [vmem:[#allocation7 + $0x870] sm:$0xf0]  ;;  %v4661_v28 = vld [vmem:[#allocation7 + $0x174] sm:$0xf0] }
 0x16a   :  { %v4944_v37 = vld [vmem:[#allocation7 + $0xa54] sm:$0xf]  ;;  %v4157_v43 = vor.u32 %v4880_v34, %v4154_v35  ;;  %2862 = vmatpush.bf16.msra.mxu1 %v3901_v42  ;;  %v3520_v29 = vld [vmem:[#allocation7 + $0x358] sm:$0xf]  ;;  %v2632_v35 = vadd.f32 %v5250_v21, %v2619_v25  ;;  %v3265_v36 = vor.u32 %v4661_v28, %v3264_v27 }
 0x16b   :  { %v4410_v38 = vld [vmem:[#allocation7 + $0xa70] sm:$0xf0]  ;;  %v4725_v31 = vld [vmem:[#allocation7 + $0x374] sm:$0xf0] }
 0x16c   :  { %v4744_v40 = vld [vmem:[#allocation7 + $0x414] sm:$0xf]  ;;  %v4413_v45 = vor.u32 %v4944_v37, %v4410_v38  ;;  %2875 = vmatpush.bf16.msra.mxu2 %v4157_v43  ;;  %v4789_v33 = vld [vmem:[#allocation7 + $0x574] sm:$0xf0]  ;;  %v3521_v37 = vor.u32 %v4725_v31, %v3520_v29  ;;  %v5263_v19 = vpop.f32.mrf.mxu3 }
 0x16d   :  { %v3610_v41 = vld [vmem:[#allocation7 + $0x430] sm:$0xf0]  ;;  %v4032_v34 = vld [vmem:[#allocation7 + $0x758] sm:$0xf]  ;;  %v3777_v38 = vor.u32 %v4789_v33, %v3776_v32 }
 0x16e   :  { %v4808_v44 = vld [vmem:[#allocation7 + $0x614] sm:$0xf]  ;;  %v3613_v0 = vor.u32 %v4744_v40, %v3610_v41  ;;  %2888 = vmatpush.bf16.msra.mxu3 %v4413_v45  ;;  %v4853_v20 = vld [vmem:[#allocation7 + $0x774] sm:$0xf0] }
 0x16f   :  { %v3866_v46 = vld [vmem:[#allocation7 + $0x630] sm:$0xf0]  ;;  %v3232_v39 = vld [vmem:[#allocation7 + $0x118] sm:$0xf]  ;;  %v4033_v42 = vor.u32 %v4853_v20, %v4032_v34 }
 0x170   :  { %v4872_v47 = vld [vmem:[#allocation7 + $0x814] sm:$0xf]  ;;  %v3869_v6 = vor.u32 %v4808_v44, %v3866_v46  ;;  %2850 = vmatpush.bf16.msra.mxu0 %v3613_v0  ;;  %v4653_v40 = vld [vmem:[#allocation7 + $0x134] sm:$0xf0] }
 0x171   :  { %v4122_v51 = vld [vmem:[#allocation7 + $0x830] sm:$0xf0]  ;;  %v3488_v41 = vld [vmem:[#allocation7 + $0x318] sm:$0xf]  ;;  %v3233_v21 = vor.u32 %v4653_v40, %v3232_v39 }
 0x172   :  { %v4936_v53 = vld [vmem:[#allocation7 + $0xa14] sm:$0xf]  ;;  %v4125_v50 = vor.u32 %v4872_v47, %v4122_v51  ;;  %2863 = vmatpush.bf16.msra.mxu1 %v3869_v6  ;;  %v4717_v43 = vld [vmem:[#allocation7 + $0x334] sm:$0xf0]  ;;  %v2644_v51 = vpop.f32.mrf.mxu0 }
 0x173   :  { %v4378_v54 = vld [vmem:[#allocation7 + $0xa30] sm:$0xf0]  ;;  %2851 = vmatmul.bf16.vlgmr.msra.gmra.mxu0 %v5192_v52  ;;  %v3744_v44 = vld [vmem:[#allocation7 + $0x518] sm:$0xf]  ;;  %v3489_v49 = vor.u32 %v4717_v43, %v3488_v41 }
 0x174   :  { %v4381_v9 = vor.u32 %v4936_v53, %v4378_v54  ;;  %2876 = vmatpush.bf16.msra.mxu2 %v4125_v50  ;;  %2895 = vmatpush.bf16.msrb.mxu0 %v3329_v10  ;;  %v4781_v46 = vld [vmem:[#allocation7 + $0x534] sm:$0xf0]  ;;  %v2645_v53 = vadd.f32 %v2644_v51, %v2632_v35  ;;  %v2657_v54 = vpop.f32.mrf.mxu1 }
 0x175   :  { %2864 = vmatmul.bf16.vlgmr.msra.gmra.mxu1 %v5194_v55  ;;  %v4000_v47 = vld [vmem:[#allocation7 + $0x718] sm:$0xf]  ;;  %v3745_v56 = vor.u32 %v4781_v46, %v3744_v44 }
 0x176   :  { %2889 = vmatpush.bf16.msra.mxu3 %v4381_v9  ;;  %2908 = vmatpush.bf16.msrb.mxu1 %v3585_v11  ;;  %v4845_v45 = vld [vmem:[#allocation7 + $0x734] sm:$0xf0]  ;;  %v2658_v5 = vadd.f32 %v2657_v54, %v2645_v53  ;;  %v2685_v53 = vpop.f32.mrf.mxu3 }
 0x177   :  { %2877 = vmatmul.bf16.vlgmr.msra.gmra.mxu2 %v5202_v58  ;;  %v4645_v61 = vld [vmem:[#allocation7 + $0xf4] sm:$0xf0]  ;;  %v4001_v63 = vor.u32 %v4845_v45, %v4000_v47 }
 0x178   :  { %2921 = vmatpush.bf16.msrb.mxu2 %v3841_v12  ;;  %2896 = vmatpush.bf16.msrb.mxu0 %v3297_v24  ;;  %v3456_v62 = vld [vmem:[#allocation7 + $0x2d8] sm:$0xf]  ;;  %v3201_v7 = vor.u32 %v4645_v61, %v3200_v57  ;;  %3053 = vst [vmem:[#allocation10 + $0x10] sm:$0xff] %v2658_v5  ;;  %v3330_v57 = vld [vmem:[#allocation7 + $0x1f8] sm:$0xf0] }
 0x179   :  { %2890 = vmatmul.bf16.vlgmr.msra.gmra.mxu3 %v5204_v1  ;;  %v4709_v0 = vld [vmem:[#allocation7 + $0x2f4] sm:$0xf0] }
 0x17a   :  { %2934 = vmatpush.bf16.msrb.mxu3 %v4097_v16  ;;  %2909 = vmatpush.bf16.msrb.mxu1 %v3553_v4  ;;  %v3712_v2 = vld [vmem:[#allocation7 + $0x4d8] sm:$0xf]  ;;  %v3457_v8 = vor.u32 %v4709_v0, %v3456_v62  ;;  %v5261_v16 = vpop.f32.mrf.mxu2  ;;  %v2646_v22 = vpop.f32.mrf.mxu0  ;;  %v3586_v0 = vld [vmem:[#allocation7 + $0x3f8] sm:$0xf0] }
 0x17b   :  { %v4773_v3 = vld [vmem:[#allocation7 + $0x4f4] sm:$0xf0] }
 0x17c   :  { %2922 = vmatpush.bf16.msrb.mxu2 %v3809_v26  ;;  %2897 = vmatpush.bf16.msrb.mxu0 %v3265_v36  ;;  %v3968_v6 = vld [vmem:[#allocation7 + $0x6d8] sm:$0xf]  ;;  %v3713_v9 = vor.u32 %v4773_v3, %v3712_v2  ;;  %v2659_v24 = vpop.f32.mrf.mxu1 }
 0x17d   :  { %v4837_v50 = vld [vmem:[#allocation7 + $0x6f4] sm:$0xf0] }
 0x17e   :  { %2935 = vmatpush.bf16.msrb.mxu3 %v4065_v30  ;;  %2910 = vmatpush.bf16.msrb.mxu1 %v3521_v37  ;;  %v3168_v10 = vld [vmem:[#allocation7 + $0x98] sm:$0xf]  ;;  %v3969_v12 = vor.u32 %v4837_v50, %v3968_v6 }
 0x17f   :  { %v4637_v59 = vld [vmem:[#allocation7 + $0xb4] sm:$0xf0] }
 0x180   :  { %2923 = vmatpush.bf16.msrb.mxu2 %v3777_v38  ;;  %2898 = vmatpush.bf16.msrb.mxu0 %v3233_v21  ;;  %v3424_v11 = vld [vmem:[#allocation7 + $0x298] sm:$0xf]  ;;  %v3169_v23 = vor.u32 %v4637_v59, %v3168_v10 }
 0x181   :  { %v4701_v13 = vld [vmem:[#allocation7 + $0x2b4] sm:$0xf0] }
 0x182   :  { %2936 = vmatpush.bf16.msrb.mxu3 %v4033_v42  ;;  %2911 = vmatpush.bf16.msrb.mxu1 %v3489_v49  ;;  %v3680_v14 = vld [vmem:[#allocation7 + $0x498] sm:$0xf]  ;;  %v3425_v25 = vor.u32 %v4701_v13, %v3424_v11  ;;  %v2672_v47 = vpop.f32.mrf.mxu2  ;;  %v3298_v13 = vld [vmem:[#allocation7 + $0x1b8] sm:$0xf0] }
 0x183   :  { %v4765_v15 = vld [vmem:[#allocation7 + $0x4b4] sm:$0xf0] }
 0x184   :  { %2924 = vmatpush.bf16.msrb.mxu2 %v3745_v56  ;;  %v3936_v17 = vld [vmem:[#allocation7 + $0x698] sm:$0xf]  ;;  %2899 = vmatpush.bf16.msrb.mxu0 %v3201_v7  ;;  %v3681_v4 = vor.u32 %v4765_v15, %v3680_v14  ;;  %v4673_v56 = vld [vmem:[#allocation7 + $0x1dc] sm:$0xf] }
 0x185   :  { %v4829_v18 = vld [vmem:[#allocation7 + $0x6b4] sm:$0xf0]  ;;  %v3333_v50 = vor.u32 %v4673_v56, %v3330_v57  ;;  %v4729_v14 = vld [vmem:[#allocation7 + $0x39c] sm:$0xf] }
 0x186   :  { %2937 = vmatpush.bf16.msrb.mxu3 %v4001_v63  ;;  %2912 = vmatpush.bf16.msrb.mxu1 %v3457_v8  ;;  %v3136_v26 = vld [vmem:[#allocation7 + $0x58] sm:$0xf]  ;;  %v3937_v29 = vor.u32 %v4829_v18, %v3936_v17  ;;  %v4737_v63 = vld [vmem:[#allocation7 + $0x3dc] sm:$0xf] }
 0x187   :  { %v4629_v27 = vld [vmem:[#allocation7 + $0x74] sm:$0xf0]  ;;  %v3589_v59 = vor.u32 %v4737_v63, %v3586_v0  ;;  %v3554_v15 = vld [vmem:[#allocation7 + $0x3b8] sm:$0xf0] }
 0x188   :  { %2925 = vmatpush.bf16.msrb.mxu2 %v3713_v9  ;;  %v3392_v28 = vld [vmem:[#allocation7 + $0x258] sm:$0xf]  ;;  %2900 = vmatpush.bf16.msrb.mxu0 %v3169_v23  ;;  %v3137_v20 = vor.u32 %v4629_v27, %v3136_v26  ;;  %v5265_v9 = vld [vmem:[#allocation8] sm:$0xff]  ;;  %v3557_v26 = vor.u32 %v4729_v14, %v3554_v15  ;;  %v4641_v56 = vld [vmem:[#allocation7 + $0xdc] sm:$0xf] }
 0x189   :  { %v4693_v30 = vld [vmem:[#allocation7 + $0x274] sm:$0xf0]  ;;  %v494_v10 = vperm.slane %v5265_v9, 3  ;;  %v2709_v53 = vpop.f32.mrf.mxu1  ;;  %v3202_v57 = vld [vmem:[#allocation7 + $0xf8] sm:$0xf0] }
 0x18a   :  { %2938 = vmatpush.bf16.msrb.mxu3 %v3969_v12  ;;  %v3648_v31 = vld [vmem:[#allocation7 + $0x458] sm:$0xf]  ;;  %2913 = vmatpush.bf16.msrb.mxu1 %v3425_v25  ;;  %v3393_v37 = vor.u32 %v4693_v30, %v3392_v28  ;;  %v4665_v12 = vld [vmem:[#allocation7 + $0x19c] sm:$0xf] }
 0x18b   :  { %v4757_v32 = vld [vmem:[#allocation7 + $0x474] sm:$0xf0]  ;;  %v3301_v22 = vor.u32 %v4665_v12, %v3298_v13  ;;  %v2671_v23 = vadd.f32 %v5261_v16, %v494_v10  ;;  %v4657_v28 = vld [vmem:[#allocation7 + $0x15c] sm:$0xf] }
 0x18c   :  { %v3904_v33 = vld [vmem:[#allocation7 + $0x658] sm:$0xf]  ;;  %2926 = vmatpush.bf16.msrb.mxu2 %v3681_v4  ;;  %v3649_v38 = vor.u32 %v4757_v32, %v3648_v31  ;;  %2901 = vmatpush.bf16.msrb.mxu0 %v3137_v20  ;;  %v4721_v30 = vld [vmem:[#allocation7 + $0x35c] sm:$0xf] }
 0x18d   :  { %v4821_v34 = vld [vmem:[#allocation7 + $0x674] sm:$0xf0]  ;;  %v3522_v31 = vld [vmem:[#allocation7 + $0x378] sm:$0xf0]  ;;  %v2684_v16 = vadd.f32 %v5263_v19, %v2671_v23 }
 0x18e   :  { %v3104_v35 = vld [vmem:[#allocation7 + $0x18] sm:$0xf]  ;;  %2939 = vmatpush.bf16.msrb.mxu3 %v3937_v29  ;;  %v3905_v42 = vor.u32 %v4821_v34, %v3904_v33  ;;  %2914 = vmatpush.bf16.msrb.mxu1 %v3393_v37  ;;  %v3266_v29 = vld [vmem:[#allocation7 + $0x178] sm:$0xf0]  ;;  %v3525_v37 = vor.u32 %v4721_v30, %v3522_v31 }
 0x18f   :  { %v4621_v36 = vld [vmem:[#allocation7 + $0x34] sm:$0xf0]  ;;  %v3269_v34 = vor.u32 %v4657_v28, %v3266_v29  ;;  %v4697_v14 = vld [vmem:[#allocation7 + $0x29c] sm:$0xf] }
 0x190   :  { %v3360_v39 = vld [vmem:[#allocation7 + $0x218] sm:$0xf]  ;;  %v3105_v54 = vor.u32 %v4621_v36, %v3104_v35  ;;  %2927 = vmatpush.bf16.msrb.mxu2 %v3649_v38  ;;  %v3426_v15 = vld [vmem:[#allocation7 + $0x2b8] sm:$0xf0] }
 0x191   :  { %v4685_v40 = vld [vmem:[#allocation7 + $0x234] sm:$0xf0]  ;;  %v2711_v28 = vpop.f32.mrf.mxu1  ;;  %v3429_v29 = vor.u32 %v4697_v14, %v3426_v15  ;;  %v4625_v30 = vld [vmem:[#allocation7 + $0x5c] sm:$0xf] }
 0x192   :  { %v3616_v41 = vld [vmem:[#allocation7 + $0x418] sm:$0xf]  ;;  %v3361_v61 = vor.u32 %v4685_v40, %v3360_v39  ;;  %2940 = vmatpush.bf16.msrb.mxu3 %v3905_v42  ;;  %2902 = vmatpush.bf16.msrb.mxu0 %v3105_v54  ;;  %v4649_v39 = vld [vmem:[#allocation7 + $0x11c] sm:$0xf] }
 0x193   :  { %v4749_v43 = vld [vmem:[#allocation7 + $0x434] sm:$0xf0]  ;;  %v3234_v40 = vld [vmem:[#allocation7 + $0x138] sm:$0xf0]  ;;  %v2735_v13 = vpop.f32.mrf.mxu3 }
 0x194   :  { %v3872_v44 = vld [vmem:[#allocation7 + $0x618] sm:$0xf]  ;;  %v3617_v62 = vor.u32 %v4749_v43, %v3616_v41  ;;  %2915 = vmatpush.bf16.msrb.mxu1 %v3361_v61  ;;  %v4713_v41 = vld [vmem:[#allocation7 + $0x31c] sm:$0xf]  ;;  %v3237_v47 = vor.u32 %v4649_v39, %v3234_v40 }
 0x195   :  { %v4813_v46 = vld [vmem:[#allocation7 + $0x634] sm:$0xf0]  ;;  %2903 = vmatmul.bf16.vlgmr.msrb.gmra.mxu0 %v5190_v48  ;;  %v3490_v42 = vld [vmem:[#allocation7 + $0x338] sm:$0xf0] }
 0x196   :  { %v4352_v45 = vld [vmem:[#allocation7 + $0x9d8] sm:$0xf]  ;;  %v3873_v2 = vor.u32 %v4813_v46, %v3872_v44  ;;  %2928 = vmatpush.bf16.msrb.mxu2 %v3617_v62  ;;  %v2696_v44 = vpop.f32.mrf.mxu0  ;;  %v3493_v54 = vor.u32 %v4713_v41, %v3490_v42  ;;  %v4705_v61 = vld [vmem:[#allocation7 + $0x2dc] sm:$0xf] }
 0x197   :  { %v4933_v51 = vld [vmem:[#allocation7 + $0x9f4] sm:$0xf0]  ;;  %2916 = vmatmul.bf16.vlgmr.msrb.gmra.mxu1 %v5196_v60  ;;  %v3458_v62 = vld [vmem:[#allocation7 + $0x2f8] sm:$0xf0] }
 0x198   :  { %v4608_v21 = vld [vmem:[#allocation7 + $0xbd8] sm:$0xf]  ;;  %v4353_v3 = vor.u32 %v4933_v51, %v4352_v45  ;;  %2941 = vmatpush.bf16.msrb.mxu3 %v3873_v2  ;;  %v3138_v31 = vld [vmem:[#allocation7 + $0x78] sm:$0xf0] }
 0x199   :  { %v4997_v49 = vld [vmem:[#allocation7 + $0xbf4] sm:$0xf0]  ;;  %2929 = vmatmul.bf16.vlgmr.msrb.gmra.mxu2 %v5192_v52  ;;  %v4617_v39 = vld [vmem:[#allocation7 + $0x1c] sm:$0xf] }
 0x19a   :  { %v4320_v5 = vld [vmem:[#allocation7 + $0x998] sm:$0xf]  ;;  %v4609_v6 = vor.u32 %v4997_v49, %v4608_v21  ;;  %2947 = vmatpush.bf16.msra.mxu0 %v4353_v3  ;;  %2973 = vmatpush.bf16.msra.mxu2 %v3333_v50  ;;  %v2697_v21 = vadd.f32 %v2696_v44, %v2684_v16  ;;  %v3205_v3 = vor.u32 %v4641_v56, %v3202_v57  ;;  %v3394_v16 = vld [vmem:[#allocation7 + $0x278] sm:$0xf0] }
 0x19b   :  { %v4925_v7 = vld [vmem:[#allocation7 + $0x9b4] sm:$0xf0]  ;;  %2942 = vmatmul.bf16.vlgmr.msrb.gmra.mxu3 %v5194_v55  ;;  %v3106_v42 = vld [vmem:[#allocation7 + $0x38] sm:$0xf0] }
 0x19c   :  { %v4576_v8 = vld [vmem:[#allocation7 + $0xb98] sm:$0xf]  ;;  %v4321_v17 = vor.u32 %v4925_v7, %v4320_v5  ;;  %2960 = vmatpush.bf16.msra.mxu1 %v4609_v6  ;;  %2986 = vmatpush.bf16.msra.mxu3 %v3589_v59  ;;  %v2710_v63 = vadd.f32 %v2709_v53, %v2697_v21  ;;  %v2722_v7 = vpop.f32.mrf.mxu2  ;;  %v4633_v59 = vld [vmem:[#allocation7 + $0x9c] sm:$0xf]  ;;  %v3109_v56 = vor.u32 %v4617_v39, %v3106_v42 }
 0x19d   :  { %v4989_v11 = vld [vmem:[#allocation7 + $0xbb4] sm:$0xf0]  ;;  %v3362_v44 = vld [vmem:[#allocation7 + $0x238] sm:$0xf0] }
 0x19e   :  { %v4577_v18 = vor.u32 %v4989_v11, %v4576_v8  ;;  %v4288_v24 = vld [vmem:[#allocation7 + $0x958] sm:$0xf]  ;;  %2948 = vmatpush.bf16.msra.mxu0 %v4321_v17  ;;  %2974 = vmatpush.bf16.msra.mxu2 %v3301_v22  ;;  %v3461_v8 = vor.u32 %v4705_v61, %v3458_v62  ;;  %v3170_v11 = vld [vmem:[#allocation7 + $0xb8] sm:$0xf0]  ;;  %v2723_v12 = vadd.f32 %v2722_v7, %v2710_v63  ;;  %v2698_v23 = vpop.f32.mrf.mxu0 }
 0x19f   :  { %v4917_v25 = vld [vmem:[#allocation7 + $0x974] sm:$0xf0]  ;;  %v4098_v21 = vld [vmem:[#allocation7 + $0x7f8] sm:$0xf0] }
 0x1a0   :  { %v4544_v4 = vld [vmem:[#allocation7 + $0xb58] sm:$0xf]  ;;  %v4289_v32 = vor.u32 %v4917_v25, %v4288_v24  ;;  %2961 = vmatpush.bf16.msra.mxu1 %v4577_v18  ;;  %2987 = vmatpush.bf16.msra.mxu3 %v3557_v26  ;;  %v2736_v18 = vadd.f32 %v2735_v13, %v2723_v12  ;;  %v3173_v25 = vor.u32 %v4633_v59, %v3170_v11  ;;  %v4929_v53 = vld [vmem:[#allocation7 + $0x9dc] sm:$0xf] }
 0x1a1   :  { %v4981_v27 = vld [vmem:[#allocation7 + $0xb74] sm:$0xf0]  ;;  %v4993_v57 = vld [vmem:[#allocation7 + $0xbdc] sm:$0xf] }
 0x1a2   :  { %v4545_v33 = vor.u32 %v4981_v27, %v4544_v4  ;;  %v4256_v20 = vld [vmem:[#allocation7 + $0x918] sm:$0xf]  ;;  %2949 = vmatpush.bf16.msra.mxu0 %v4289_v32  ;;  %2975 = vmatpush.bf16.msra.mxu2 %v3269_v34  ;;  %3054 = vst [vmem:[#allocation10 + $0x18] sm:$0xff] %v2736_v18  ;;  %v4689_v32 = vld [vmem:[#allocation7 + $0x25c] sm:$0xf] }
 0x1a3   :  { %v4909_v35 = vld [vmem:[#allocation7 + $0x934] sm:$0xf0]  ;;  %v3397_v41 = vor.u32 %v4689_v32, %v3394_v16  ;;  %v4610_v61 = vld [vmem:[#allocation7 + $0xbf8] sm:$0xf0] }
 0x1a4   :  { %v4512_v36 = vld [vmem:[#allocation7 + $0xb18] sm:$0xf]  ;;  %v4257_v43 = vor.u32 %v4909_v35, %v4256_v20  ;;  %2962 = vmatpush.bf16.msra.mxu1 %v4545_v33  ;;  %2988 = vmatpush.bf16.msra.mxu3 %v3525_v37  ;;  %v2724_v40 = vpop.f32.mrf.mxu2  ;;  %v4066_v7 = vld [vmem:[#allocation7 + $0x7b8] sm:$0xf0] }
 0x1a5   :  { %v4973_v38 = vld [vmem:[#allocation7 + $0xb34] sm:$0xf0]  ;;  %v4985_v59 = vld [vmem:[#allocation7 + $0xb9c] sm:$0xf] }
 0x1a6   :  { %v4513_v46 = vor.u32 %v4973_v38, %v4512_v36  ;;  %v4224_v19 = vld [vmem:[#allocation7 + $0x8d8] sm:$0xf]  ;;  %2950 = vmatpush.bf16.msra.mxu0 %v4257_v43  ;;  %2976 = vmatpush.bf16.msra.mxu2 %v3237_v47  ;;  %v3141_v36 = vor.u32 %v4625_v30, %v3138_v31  ;;  %v4681_v43 = vld [vmem:[#allocation7 + $0x21c] sm:$0xf] }
 0x1a7   :  { %v4901_v45 = vld [vmem:[#allocation7 + $0x8f4] sm:$0xf0]  ;;  %v4801_v47 = vld [vmem:[#allocation7 + $0x5dc] sm:$0xf]  ;;  %v3365_v62 = vor.u32 %v4681_v43, %v3362_v44 }
 0x1a8   :  { %v4480_v51 = vld [vmem:[#allocation7 + $0xad8] sm:$0xf]  ;;  %v4225_v0 = vor.u32 %v4901_v45, %v4224_v19  ;;  %2963 = vmatpush.bf16.msra.mxu1 %v4513_v46  ;;  %2989 = vmatpush.bf16.msra.mxu3 %v3493_v54  ;;  %v2737_v46 = vpop.f32.mrf.mxu3  ;;  %v3842_v19 = vld [vmem:[#allocation7 + $0x5f8] sm:$0xf0] }
 0x1a9   :  { %v4965_v49 = vld [vmem:[#allocation7 + $0xaf4] sm:$0xf0]  ;;  %v4865_v45 = vld [vmem:[#allocation7 + $0x7dc] sm:$0xf]  ;;  %v3845_v63 = vor.u32 %v4801_v47, %v3842_v19  ;;  %v5280_v42 = vpop.f32.mrf.mxu1 }
 0x1aa   :  { %v4481_v2 = vor.u32 %v4965_v49, %v4480_v51  ;;  %v4192_v5 = vld [vmem:[#allocation7 + $0x898] sm:$0xf]  ;;  %2951 = vmatpush.bf16.msra.mxu0 %v4225_v0  ;;  %2977 = vmatpush.bf16.msra.mxu2 %v3205_v3  ;;  %v4354_v54 = vld [vmem:[#allocation7 + $0x9f8] sm:$0xf0]  ;;  %v4101_v0 = vor.u32 %v4865_v45, %v4098_v21 }
 0x1ab   :  { %v4893_v6 = vld [vmem:[#allocation7 + $0x8b4] sm:$0xf0]  ;;  %v4793_v3 = vld [vmem:[#allocation7 + $0x59c] sm:$0xf] }
 0x1ac   :  { %v4448_v50 = vld [vmem:[#allocation7 + $0xa98] sm:$0xf]  ;;  %v4193_v17 = vor.u32 %v4893_v6, %v4192_v5  ;;  %2964 = vmatpush.bf16.msra.mxu1 %v4481_v2  ;;  %2990 = vmatpush.bf16.msra.mxu3 %v3461_v8  ;;  %v4357_v2 = vor.u32 %v4929_v53, %v4354_v54  ;;  %v3810_v5 = vld [vmem:[#allocation7 + $0x5b8] sm:$0xf0] }
 0x1ad   :  { %v4957_v10 = vld [vmem:[#allocation7 + $0xab4] sm:$0xf0]  ;;  %v4857_v6 = vld [vmem:[#allocation7 + $0x79c] sm:$0xf]  ;;  %v3813_v12 = vor.u32 %v4793_v3, %v3810_v5 }
 0x1ae   :  { %v4160_v22 = vld [vmem:[#allocation7 + $0x858] sm:$0xf]  ;;  %v4449_v24 = vor.u32 %v4957_v10, %v4448_v50  ;;  %2952 = vmatpush.bf16.msra.mxu0 %v4193_v17  ;;  %2978 = vmatpush.bf16.msra.mxu2 %v3173_v25  ;;  %v4613_v50 = vor.u32 %v4993_v57, %v4610_v61  ;;  %v4921_v8 = vld [vmem:[#allocation7 + $0x99c] sm:$0xf]  ;;  %v4069_v13 = vor.u32 %v4857_v6, %v4066_v7 }
 0x1af   :  { %v4885_v4 = vld [vmem:[#allocation7 + $0x874] sm:$0xf0]  ;;  %v4322_v10 = vld [vmem:[#allocation7 + $0x9b8] sm:$0xf0] }
 0x1b0   :  { %v4416_v26 = vld [vmem:[#allocation7 + $0xa58] sm:$0xf]  ;;  %v4161_v33 = vor.u32 %v4885_v4, %v4160_v22  ;;  %2965 = vmatpush.bf16.msra.mxu1 %v4449_v24  ;;  %2991 = vmatpush.bf16.msra.mxu3 %v3429_v29  ;;  %v4578_v11 = vld [vmem:[#allocation7 + $0xbb8] sm:$0xf0]  ;;  %v4325_v14 = vor.u32 %v4921_v8, %v4322_v10 }
 0x1b1   :  { %v4949_v27 = vld [vmem:[#allocation7 + $0xa74] sm:$0xf0]  ;;  %v4785_v15 = vld [vmem:[#allocation7 + $0x55c] sm:$0xf]  ;;  %v4581_v22 = vor.u32 %v4985_v59, %v4578_v11 }
 0x1b2   :  { %v4128_v34 = vld [vmem:[#allocation7 + $0x818] sm:$0xf]  ;;  %v4417_v35 = vor.u32 %v4949_v27, %v4416_v26  ;;  %2953 = vmatpush.bf16.msra.mxu0 %v4161_v33  ;;  %2979 = vmatpush.bf16.msra.mxu2 %v3141_v36  ;;  %v3778_v17 = vld [vmem:[#allocation7 + $0x578] sm:$0xf0] }
 0x1b3   :  { %v4877_v20 = vld [vmem:[#allocation7 + $0x834] sm:$0xf0]  ;;  %v4849_v18 = vld [vmem:[#allocation7 + $0x75c] sm:$0xf]  ;;  %v3781_v27 = vor.u32 %v4785_v15, %v3778_v17 }
 0x1b4   :  { %v4384_v37 = vld [vmem:[#allocation7 + $0xa18] sm:$0xf]  ;;  %v4129_v51 = vor.u32 %v4877_v20, %v4128_v34  ;;  %2966 = vmatpush.bf16.msra.mxu1 %v4417_v35  ;;  %2992 = vmatpush.bf16.msra.mxu3 %v3397_v41  ;;  %v4034_v23 = vld [vmem:[#allocation7 + $0x778] sm:$0xf0]  ;;  %v5278_v35 = vpop.f32.mrf.mxu0 }
 0x1b5   :  { %v4941_v38 = vld [vmem:[#allocation7 + $0xa34] sm:$0xf0]  ;;  %v4913_v24 = vld [vmem:[#allocation7 + $0x95c] sm:$0xf]  ;;  %v4037_v28 = vor.u32 %v4849_v18, %v4034_v23  ;;  %v495_v18 = vperm.slane %v5265_v9, 4 }
 0x1b6   :  { %v4385_v49 = vor.u32 %v4941_v38, %v4384_v37  ;;  %2954 = vmatpush.bf16.msra.mxu0 %v4129_v51  ;;  %2980 = vmatpush.bf16.msra.mxu2 %v3109_v56  ;;  %v4290_v25 = vld [vmem:[#allocation7 + $0x978] sm:$0xf0] }
 0x1b7   :  { %v4977_v4 = vld [vmem:[#allocation7 + $0xb5c] sm:$0xf]  ;;  %v4293_v29 = vor.u32 %v4913_v24, %v4290_v25 }
 0x1b8   :  { %2967 = vmatpush.bf16.msra.mxu1 %v4385_v49  ;;  %2993 = vmatpush.bf16.msra.mxu3 %v3365_v62  ;;  %v4546_v26 = vld [vmem:[#allocation7 + $0xb78] sm:$0xf0] }
 0x1b9   :  { %2955 = vmatmul.bf16.vlgmr.msra.gmra.mxu0 %v5202_v58  ;;  %2981 = vmatmul.bf16.vlgmr.msra.gmra.mxu2 %v5190_v48  ;;  %v4777_v30 = vld [vmem:[#allocation7 + $0x51c] sm:$0xf]  ;;  %v4549_v16 = vor.u32 %v4977_v4, %v4546_v26 }
 0x1ba   :  { %2999 = vmatpush.bf16.msrb.mxu0 %v3845_v63  ;;  %3025 = vmatpush.bf16.msrb.mxu2 %v4357_v2  ;;  %v3746_v31 = vld [vmem:[#allocation7 + $0x538] sm:$0xf0]  ;;  %v2787_v2 = vpop.f32.mrf.mxu3 }
 0x1bb   :  { %2994 = vmatmul.bf16.vlgmr.msra.gmra.mxu3 %v5196_v60  ;;  %2968 = vmatmul.bf16.vlgmr.msra.gmra.mxu1 %v5204_v1  ;;  %v4841_v32 = vld [vmem:[#allocation7 + $0x71c] sm:$0xf]  ;;  %v3749_v36 = vor.u32 %v4777_v30, %v3746_v31 }
 0x1bc   :  { %3012 = vmatpush.bf16.msrb.mxu1 %v4101_v0  ;;  %3038 = vmatpush.bf16.msrb.mxu3 %v4613_v50  ;;  %v4002_v33 = vld [vmem:[#allocation7 + $0x738] sm:$0xf0]  ;;  %v2774_v0 = vpop.f32.mrf.mxu2  ;;  %v2750_v6 = vpop.f32.mrf.mxu0 }
 0x1bd   :  { %v4905_v34 = vld [vmem:[#allocation7 + $0x91c] sm:$0xf]  ;;  %v4005_v37 = vor.u32 %v4841_v32, %v4002_v33 }
 0x1be   :  { %3000 = vmatpush.bf16.msrb.mxu0 %v3813_v12  ;;  %3026 = vmatpush.bf16.msrb.mxu2 %v4325_v14  ;;  %v4258_v48 = vld [vmem:[#allocation7 + $0x938] sm:$0xf0] }
 0x1bf   :  { %v4969_v20 = vld [vmem:[#allocation7 + $0xb1c] sm:$0xf]  ;;  %v4261_v38 = vor.u32 %v4905_v34, %v4258_v48 }
 0x1c0   :  { %3013 = vmatpush.bf16.msrb.mxu1 %v4069_v13  ;;  %3039 = vmatpush.bf16.msrb.mxu3 %v4581_v22  ;;  %v4514_v60 = vld [vmem:[#allocation7 + $0xb38] sm:$0xf0]  ;;  %v2763_v13 = vpop.f32.mrf.mxu1 }
 0x1c1   :  { %v4769_v39 = vld [vmem:[#allocation7 + $0x4dc] sm:$0xf]  ;;  %v4517_v43 = vor.u32 %v4969_v20, %v4514_v60 }
 0x1c2   :  { %3001 = vmatpush.bf16.msrb.mxu0 %v3781_v27  ;;  %3027 = vmatpush.bf16.msrb.mxu2 %v4293_v29  ;;  %v3714_v40 = vld [vmem:[#allocation7 + $0x4f8] sm:$0xf0]  ;;  %v2789_v34 = vpop.f32.mrf.mxu3 }
 0x1c3   :  { %v4833_v41 = vld [vmem:[#allocation7 + $0x6dc] sm:$0xf]  ;;  %v3717_v51 = vor.u32 %v4769_v39, %v3714_v40 }
 0x1c4   :  { %3014 = vmatpush.bf16.msrb.mxu1 %v4037_v28  ;;  %3040 = vmatpush.bf16.msrb.mxu3 %v4549_v16  ;;  %v3970_v44 = vld [vmem:[#allocation7 + $0x6f8] sm:$0xf0]  ;;  %v2749_v16 = vadd.f32 %v5278_v35, %v495_v18  ;;  %v2776_v33 = vpop.f32.mrf.mxu2 }
 0x1c5   :  { %v4897_v46 = vld [vmem:[#allocation7 + $0x8dc] sm:$0xf]  ;;  %v3973_v21 = vor.u32 %v4833_v41, %v3970_v44 }
 0x1c6   :  { %v4226_v47 = vld [vmem:[#allocation7 + $0x8f8] sm:$0xf0]  ;;  %3002 = vmatpush.bf16.msrb.mxu0 %v3749_v36  ;;  %3028 = vmatpush.bf16.msrb.mxu2 %v4261_v38  ;;  %v2762_v39 = vadd.f32 %v5280_v42, %v2749_v16 }
 0x1c7   :  { %v4961_v19 = vld [vmem:[#allocation7 + $0xadc] sm:$0xf]  ;;  %v4229_v53 = vor.u32 %v4897_v46, %v4226_v47 }
 0x1c8   :  { %v4482_v45 = vld [vmem:[#allocation7 + $0xaf8] sm:$0xf0]  ;;  %3015 = vmatpush.bf16.msrb.mxu1 %v4005_v37  ;;  %3041 = vmatpush.bf16.msrb.mxu3 %v4517_v43  ;;  %v2775_v40 = vadd.f32 %v2774_v0, %v2762_v39 }
 0x1c9   :  { %v4761_v54 = vld [vmem:[#allocation7 + $0x49c] sm:$0xf]  ;;  %v4485_v57 = vor.u32 %v4961_v19, %v4482_v45 }
 0x1ca   :  { %v3682_v49 = vld [vmem:[#allocation7 + $0x4b8] sm:$0xf0]  ;;  %3003 = vmatpush.bf16.msrb.mxu0 %v3717_v51  ;;  %3029 = vmatpush.bf16.msrb.mxu2 %v4229_v53  ;;  %v2788_v35 = vadd.f32 %v2787_v2, %v2775_v40  ;;  %v2800_v41 = vpop.f32.mrf.mxu0 }
 0x1cb   :  { %v4825_v56 = vld [vmem:[#allocation7 + $0x69c] sm:$0xf]  ;;  %v3685_v50 = vor.u32 %v4761_v54, %v3682_v49 }
 0x1cc   :  { %v3938_v61 = vld [vmem:[#allocation7 + $0x6b8] sm:$0xf0]  ;;  %3016 = vmatpush.bf16.msrb.mxu1 %v3973_v21  ;;  %3042 = vmatpush.bf16.msrb.mxu3 %v4485_v57  ;;  %v2801_v43 = vadd.f32 %v2800_v41, %v2788_v35  ;;  %v2813_v44 = vpop.f32.mrf.mxu1 }
 0x1cd   :  { %v4889_v62 = vld [vmem:[#allocation7 + $0x89c] sm:$0xf]  ;;  %v3941_v8 = vor.u32 %v4825_v56, %v3938_v61 }
 0x1ce   :  { %v4194_v63 = vld [vmem:[#allocation7 + $0x8b8] sm:$0xf0]  ;;  %3004 = vmatpush.bf16.msrb.mxu0 %v3685_v50  ;;  %v2814_v46 = vadd.f32 %v2813_v44, %v2801_v43 }
 0x1cf   :  { %v4953_v3 = vld [vmem:[#allocation7 + $0xa9c] sm:$0xf]  ;;  %v4197_v10 = vor.u32 %v4889_v62, %v4194_v63 }
 0x1d0   :  { %v4450_v5 = vld [vmem:[#allocation7 + $0xab8] sm:$0xf0]  ;;  %3017 = vmatpush.bf16.msrb.mxu1 %v3941_v8  ;;  %3055 = vst [vmem:[#allocation10 + $0x20] sm:$0xff] %v2814_v46 }
 0x1d1   :  { %v4753_v7 = vld [vmem:[#allocation7 + $0x45c] sm:$0xf]  ;;  %v4453_v14 = vor.u32 %v4953_v3, %v4450_v5  ;;  %3030 = vmatpush.bf16.msrb.mxu2 %v4197_v10  ;;  %v2826_v42 = vpop.f32.mrf.mxu2 }
 0x1d2   :  { %v3650_v59 = vld [vmem:[#allocation7 + $0x478] sm:$0xf0]  ;;  %v2802_v19 = vpop.f32.mrf.mxu0 }
 0x1d3   :  { %v4817_v11 = vld [vmem:[#allocation7 + $0x65c] sm:$0xf]  ;;  %v3653_v24 = vor.u32 %v4753_v7, %v3650_v59  ;;  %3043 = vmatpush.bf16.msrb.mxu3 %v4453_v14  ;;  %v2839_v47 = vpop.f32.mrf.mxu3  ;;  %v497_v59 = vperm.slane %v5265_v9, 6 }
 0x1d4   :  { %v3906_v12 = vld [vmem:[#allocation7 + $0x678] sm:$0xf0]  ;;  %v2815_v45 = vpop.f32.mrf.mxu1 }
 0x1d5   :  { %v4881_v15 = vld [vmem:[#allocation7 + $0x85c] sm:$0xf]  ;;  %v3909_v25 = vor.u32 %v4817_v11, %v3906_v12  ;;  %3005 = vmatpush.bf16.msrb.mxu0 %v3653_v24 }
 0x1d6   :  { %v4162_v17 = vld [vmem:[#allocation7 + $0x878] sm:$0xf0] }
 0x1d7   :  { %v4945_v22 = vld [vmem:[#allocation7 + $0xa5c] sm:$0xf]  ;;  %v4165_v4 = vor.u32 %v4881_v15, %v4162_v17  ;;  %3018 = vmatpush.bf16.msrb.mxu1 %v3909_v25 }
 0x1d8   :  { %v4418_v23 = vld [vmem:[#allocation7 + $0xa78] sm:$0xf0] }
 0x1d9   :  { %v4745_v26 = vld [vmem:[#allocation7 + $0x41c] sm:$0xf]  ;;  %v4421_v29 = vor.u32 %v4945_v22, %v4418_v23  ;;  %3031 = vmatpush.bf16.msrb.mxu2 %v4165_v4  ;;  %v2828_v51 = vpop.f32.mrf.mxu2 }
 0x1da   :  { %v3618_v27 = vld [vmem:[#allocation7 + $0x438] sm:$0xf0] }
 0x1db   :  { %v4809_v28 = vld [vmem:[#allocation7 + $0x61c] sm:$0xf]  ;;  %v3621_v60 = vor.u32 %v4745_v26, %v3618_v27  ;;  %3044 = vmatpush.bf16.msrb.mxu3 %v4421_v29  ;;  %v2841_v21 = vpop.f32.mrf.mxu3 }
 0x1dc   :  { %v3874_v30 = vld [vmem:[#allocation7 + $0x638] sm:$0xf0] }
 0x1dd   :  { %v4873_v31 = vld [vmem:[#allocation7 + $0x81c] sm:$0xf]  ;;  %v3877_v36 = vor.u32 %v4809_v28, %v3874_v30  ;;  %3006 = vmatpush.bf16.msrb.mxu0 %v3621_v60  ;;  %v498_v30 = vperm.slane %v5265_v9, 7 }
 0x1de   :  { %v4130_v32 = vld [vmem:[#allocation7 + $0x838] sm:$0xf0] }
 0x1df   :  { %v4937_v48 = vld [vmem:[#allocation7 + $0xa1c] sm:$0xf]  ;;  %v4133_v37 = vor.u32 %v4873_v31, %v4130_v32  ;;  %3019 = vmatpush.bf16.msrb.mxu1 %v3877_v36 }
 0x1e0   :  { %v4386_v20 = vld [vmem:[#allocation7 + $0xa38] sm:$0xf0]  ;;  %3007 = vmatmul.bf16.vlgmr.msrb.gmra.mxu0 %v5192_v52  ;;  %v496_v52 = vperm.slane %v5265_v9, 5 }
 0x1e1   :  { %v4389_v38 = vor.u32 %v4937_v48, %v4386_v20  ;;  %3032 = vmatpush.bf16.msrb.mxu2 %v4133_v37 }
 0x1e2   :  { %3020 = vmatmul.bf16.vlgmr.msrb.gmra.mxu1 %v5194_v55  ;;  %v2827_v53 = vadd.f32 %v2826_v42, %v496_v52 }
 0x1e3   :  { %3045 = vmatpush.bf16.msrb.mxu3 %v4389_v38 }
 0x1e4   :  { %3033 = vmatmul.bf16.vlgmr.msrb.gmra.mxu2 %v5202_v58  ;;  %v2840_v55 = vadd.f32 %v2839_v47, %v2827_v53 }
 0x1e6   :  { %3046 = vmatmul.bf16.vlgmr.msrb.gmra.mxu3 %v5204_v1 }
 0x1f0   :  { %v2852_v54 = vpop.f32.mrf.mxu0 }
 0x1f1   :  { %v2853_v58 = vadd.f32 %v2852_v54, %v2840_v55 }
 0x1f2   :  { %v2865_v49 = vpop.f32.mrf.mxu1 }
 0x1f3   :  { %v2866_v1 = vadd.f32 %v2865_v49, %v2853_v58 }
 0x1f8   :  { %v2854_v63 = vpop.f32.mrf.mxu0 }
 0x1fa   :  { %v2878_v56 = vpop.f32.mrf.mxu2  ;;  %v2867_v0 = vpop.f32.mrf.mxu1 }
 0x1fb   :  { %v2879_v57 = vadd.f32 %v2878_v56, %v2866_v1 }
 0x1fc   :  { %v2891_v61 = vpop.f32.mrf.mxu3 }
 0x1fd   :  { %v2892_v62 = vadd.f32 %v2891_v61, %v2879_v57 }
 0x1ff   :  { %3056 = vst [vmem:[#allocation10 + $0x28] sm:$0xff] %v2892_v62 }
 0x202   :  { %v2880_v2 = vpop.f32.mrf.mxu2 }
 0x204   :  { %v2893_v3 = vpop.f32.mrf.mxu3 }
 0x212   :  { %v2904_v5 = vpop.f32.mrf.mxu0 }
 0x213   :  { %v2905_v11 = vadd.f32 %v2904_v5, %v497_v59 }
 0x214   :  { %v2917_v6 = vpop.f32.mrf.mxu1 }
 0x215   :  { %v2918_v14 = vadd.f32 %v2917_v6, %v2905_v11 }
 0x21a   :  { %v2906_v8 = vpop.f32.mrf.mxu0 }
 0x21c   :  { %v2930_v50 = vpop.f32.mrf.mxu2  ;;  %v2919_v10 = vpop.f32.mrf.mxu1 }
 0x21d   :  { %v2931_v15 = vadd.f32 %v2930_v50, %v2918_v14 }
 0x21e   :  { %v2943_v7 = vpop.f32.mrf.mxu3 }
 0x21f   :  { %v2944_v17 = vadd.f32 %v2943_v7, %v2931_v15 }
 0x224   :  { %v2932_v12 = vpop.f32.mrf.mxu2 }
 0x226   :  { %v2945_v13 = vpop.f32.mrf.mxu3 }
 0x236   :  { %v2956_v18 = vpop.f32.mrf.mxu0 }
 0x237   :  { %v2957_v22 = vadd.f32 %v2956_v18, %v2944_v17 }
 0x238   :  { %v2969_v23 = vpop.f32.mrf.mxu1 }
 0x239   :  { %v2970_v24 = vadd.f32 %v2969_v23, %v2957_v22 }
 0x23b   :  { %3057 = vst [vmem:[#allocation10 + $0x30] sm:$0xff] %v2970_v24 }
 0x23c   :  { %v2982_v25 = vpop.f32.mrf.mxu2 }
 0x23d   :  { %v2983_v31 = vadd.f32 %v2982_v25, %v498_v30 }
 0x23e   :  { %v2995_v4 = vpop.f32.mrf.mxu3  ;;  %v2958_v26 = vpop.f32.mrf.mxu0 }
 0x23f   :  { %v2996_v32 = vadd.f32 %v2995_v4, %v2983_v31 }
 0x240   :  { %v2971_v27 = vpop.f32.mrf.mxu1 }
 0x244   :  { %v2984_v28 = vpop.f32.mrf.mxu2 }
 0x246   :  { %v2997_v29 = vpop.f32.mrf.mxu3 }
 0x25d   :  { %v3008_v16 = vpop.f32.mrf.mxu0 }
 0x25e   :  { %v3009_v34 = vadd.f32 %v3008_v16, %v2996_v32 }
 0x25f   :  { %v3021_v33 = vpop.f32.mrf.mxu1 }
 0x260   :  { %v3022_v48 = vadd.f32 %v3021_v33, %v3009_v34 }
 0x265   :  { %v3010_v37 = vpop.f32.mrf.mxu0 }
 0x267   :  { %v3034_v20 = vpop.f32.mrf.mxu2  ;;  %v3023_v38 = vpop.f32.mrf.mxu1 }
 0x268   :  { %v3035_v60 = vadd.f32 %v3034_v20, %v3022_v48 }
 0x269   :  { %v3047_v36 = vpop.f32.mrf.mxu3 }
 0x26a   :  { %v3048_v39 = vadd.f32 %v3047_v36, %v3035_v60 }
 0x26c   :  { %3058 = vst [vmem:[#allocation10 + $0x38] sm:$0xff] %v3048_v39 }
 0x26d   :  { %3069 = dma.vmem_to_hbm [thread:$0]  %s3065_s3, 1024, %s3067_s11, [#allocation4]  }
 0x26f   :  { %v3036_v9 = vpop.f32.mrf.mxu2 }
 0x271   :  { %v3049_v40 = vpop.f32.mrf.mxu3 }
 0x272   :  { %5144 = dma.done.wait [#allocation4], 1024  }
 0x273   :  { %5145 = vsyncadd [#allocation4], 4294966272 }
 0x274   :  { %3074 = vsyncpa [#allocation3], 1 }
 0x275   :  { %3075 = vsyncpa [#allocation6], 1 }
 0x276   :  { %3076 = vsyncpa [#allocation9], 1 }
 0x277   :  { %3077 = vsyncpa [#allocation4], 1 }

</bundles_post_ra>
